<compile_context>
chip_gen: v7x
topology: tpu7x:2x2x1
jax: 0.10.0
libtpu: 0.0.40
codegen_flags: <defaults>
</compile_context>

<pallas_src>
import functools

import jax
import jax.numpy as jnp
from jax.experimental import pallas as pl
from jax.experimental.pallas import tpu as pltpu

_BN_EPS = 1e-5
_DEEP0 = 1024                       # deep_track first layer width
_SHALLOW = 256                      # shallow_track width
_DEEP_FEAT = 128                    # deep_track output feature width
_COMBINED_IN = _DEEP_FEAT + _SHALLOW  # 384 = input width of combined[0]
_OUT = 2                            # real logits
_OUT_PAD = 128                      # lane-dense padded output width


# ---------------------------------------------------------------------------
# Fused kernel: whole forward pass for one batch tile.
# ---------------------------------------------------------------------------
def _spam_classifier_kernel(x_ref,
                            w0_ref, b0_ref,              # merged (in -> 1024 | 256), BN folded
                            w1_ref, s1_ref, b1_ref,      # 1024 -> 512, int8 + per-col scale
                            w2_ref, s2_ref, b2_ref,      # 512  -> 256, int8 + per-col scale
                            w3_ref, b3_ref,              # 256  -> 128
                            wc1d_ref, wc1s_ref, bc1_ref,  # combined[0], split by K (no concat)
                            wc2_ref, bc2_ref,            # 128 -> 128 (cols >= 2 are zero pad)
                            o_ref):
    f32 = jnp.float32
    bf16 = jnp.bfloat16

    # Merged first layer: x @ [W_deep0 | W_shallow] -> (TB, 1280).
    # fp32 epilogue, then a single bf16 cast so the big intermediate lives in bf16.
    x = x_ref[...].astype(bf16)
    h0 = jnp.dot(x, w0_ref[...], preferred_element_type=f32) + b0_ref[...]
    h0 = jnp.maximum(h0, 0.0).astype(bf16)
    deep = h0[:, :_DEEP0]            # (TB, 1024)
    shallow = h0[:, _DEEP0:]         # (TB, 256)  shallow-track output

    # deep_track layer 2 (1024 -> 512): int8 weights, per-column dequant scale
    # folded into the fp32 bias/ReLU epilogue.
    h = jnp.dot(deep, w1_ref[...].astype(bf16), preferred_element_type=f32)
    h = jnp.maximum(h * s1_ref[...] + b1_ref[...], 0.0).astype(bf16)      # (TB, 512)

    # deep_track layer 3 (512 -> 256): int8 weights.
    h = jnp.dot(h, w2_ref[...].astype(bf16), preferred_element_type=f32)
    h = jnp.maximum(h * s2_ref[...] + b2_ref[...], 0.0).astype(bf16)      # (TB, 256)

    # deep_track layer 4 (256 -> 128).
    df = jnp.dot(h, w3_ref[...], preferred_element_type=f32) + b3_ref[...]
    df = jnp.maximum(df, 0.0).astype(bf16)                                # (TB, 128)

    # combined[0]: cat([deep_feat, shallow]) @ W_c1
    #            == deep_feat @ W_c1[:128] + shallow @ W_c1[128:]
    c = (jnp.dot(df, wc1d_ref[...], preferred_element_type=f32)
         + jnp.dot(shallow, wc1s_ref[...], preferred_element_type=f32)
         + bc1_ref[...])
    c = jnp.maximum(c, 0.0).astype(bf16)                                  # (TB, 128)

    # combined[1]: Linear(128, 2) zero-padded to 128 lanes (lane-dense store).
    logits = jnp.dot(c, wc2_ref[...], preferred_element_type=f32) + bc2_ref[...]
    o_ref[...] = logits.astype(o_ref.dtype)


# ---------------------------------------------------------------------------
# Wrapper: batch grid + resident weights.
# ---------------------------------------------------------------------------
def _round_up(n, m):
    return ((n + m - 1) // m) * m


@functools.partial(jax.jit, static_argnames=("tb_max",))
def enhanced_spam_classifier_forward(x, params, *, tb_max=256):
    """EnhancedSpamClassifier.forward (eval mode) as one Pallas call."""
    b, in_f = x.shape
    tb = min(tb_max, _round_up(b, 8))            # rows per grid step
    b_pad = _round_up(b, tb)
    if b_pad != b:
        x = jnp.pad(x, ((0, b_pad - b), (0, 0)))
    num_blocks = b_pad // tb

    weights = (params["w0"], params["b0"],
               params["w1"], params["s1"], params["b1"],
               params["w2"], params["s2"], params["b2"],
               params["w3"], params["b3"],
               params["wc1d"], params["wc1s"], params["bc1"],
               params["wc2"], params["bc2"])

    def resident(a):
        # Same block at every grid step -> stays VMEM resident (no per-step re-DMA).
        return pl.BlockSpec(a.shape, lambda i: (0,) * a.ndim)

    out = pl.pallas_call(
        _spam_classifier_kernel,
        grid=(num_blocks,),
        out_shape=jax.ShapeDtypeStruct((b_pad, _OUT_PAD), jnp.float32),
        in_specs=[pl.BlockSpec((tb, in_f), lambda i: (i, 0))]
                 + [resident(a) for a in weights],
        out_specs=pl.BlockSpec((tb, _OUT_PAD), lambda i: (i, 0)),
        compiler_params=pltpu.CompilerParams(
            # Shard the batch axis across TensorCores only when there are several tiles;
            # at a single tile that would just duplicate the weight DMA.
            dimension_semantics=("parallel",) if num_blocks > 1 else ("arbitrary",),
            vmem_limit_bytes=32 * 1024 * 1024,   # safe on v5e's 16 MiB default scope
        ),
    )(x, *weights)
    # TODO(synk): for the repeated small-batch serving path, keep the weights VMEM-resident
    # across calls (cross-pallas_call prefetch / with_memory_space_constraint) instead of
    # re-streaming ~1.1 MB per call.
    return out[:b, :_OUT]


# ---------------------------------------------------------------------------
# Deterministic parameter construction with BN/bias folding (no checkpoints).
# ---------------------------------------------------------------------------
def _folded_linear(key, in_f, out_f, with_bn, running_mean=None, running_var=None):
    """PyTorch-style Linear init; eval-mode BatchNorm folded into (W, b).

    NOTE: for a trained model, the real BN running statistics must be supplied;
    the defaults (mean=0, var=1) match freshly-initialized PyTorch BatchNorm1d.
    """
    k_lin, k_bn = jax.random.split(key)
    k_w, k_b = jax.random.split(k_lin)
    bound = 1.0 / float(in_f) ** 0.5
    w = jax.random.uniform(k_w, (in_f, out_f), jnp.float32, -bound, bound)
    b = jax.random.uniform(k_b, (out_f,), jnp.float32, -bound, bound)
    if with_bn:
        k_g, k_beta = jax.random.split(k_bn)
        gamma = 1.0 + 0.1 * jax.random.normal(k_g, (out_f,), jnp.float32)
        beta = 0.1 * jax.random.normal(k_beta, (out_f,), jnp.float32)
        mean = jnp.zeros((out_f,), jnp.float32) if running_mean is None else running_mean
        var = jnp.ones((out_f,), jnp.float32) if running_var is None else running_var
        scale = gamma / jnp.sqrt(var + _BN_EPS)
        w = w * scale[None, :]
        b = (b - mean) * scale + beta
    return w, b


def _quantize_int8_per_col(w):
    amax = jnp.max(jnp.abs(w), axis=0)
    scale = jnp.maximum(amax, 1e-8) / 127.0
    q = jnp.clip(jnp.round(w / scale[None, :]), -127.0, 127.0).astype(jnp.int8)
    return q, scale.astype(jnp.float32).reshape(1, -1)


def init_params(key, input_size):
    keys = jax.random.split(key, 7)
    w_d0, b_d0 = _folded_linear(keys[0], input_size, _DEEP0, True)
    w_d1, b_d1 = _folded_linear(keys[1], _DEEP0, 512, True)
    w_d2, b_d2 = _folded_linear(keys[2], 512, 256, True)
    w_d3, b_d3 = _folded_linear(keys[3], 256, _DEEP_FEAT, True)
    w_sh, b_sh = _folded_linear(keys[4], input_size, _SHALLOW, True)
    w_c1, b_c1 = _folded_linear(keys[5], _COMBINED_IN, 128, True)
    w_c2, b_c2 = _folded_linear(keys[6], 128, _OUT, False)

    # Merge first deep layer and shallow layer into one (in, 1280) matmul.
    w0 = jnp.concatenate([w_d0, w_sh], axis=1)
    b0 = jnp.concatenate([b_d0, b_sh], axis=0)

    # Split combined[0] weight by rows to eliminate the activation concat.
    wc1_deep = w_c1[:_DEEP_FEAT, :]       # multiplies deep features (B, 128)
    wc1_shallow = w_c1[_DEEP_FEAT:, :]    # multiplies shallow features (B, 256)

    # int8 weights + per-column scales for the two largest matrices (~80% of bytes).
    w1_q, s1 = _quantize_int8_per_col(w_d1)
    w2_q, s2 = _quantize_int8_per_col(w_d2)

    # Zero-pad the 2-wide head to 128 output lanes (lane-dense final store).
    wc2_pad = jnp.pad(w_c2, ((0, 0), (0, _OUT_PAD - _OUT)))
    bc2_pad = jnp.pad(b_c2, (0, _OUT_PAD - _OUT))

    bf16 = lambda a: a.astype(jnp.bfloat16)
    row = lambda a: a.reshape(1, -1).astype(jnp.float32)
    params = {
        "w0": bf16(w0), "b0": row(b0),
        "w1": w1_q, "s1": s1, "b1": row(b_d1),
        "w2": w2_q, "s2": s2, "b2": row(b_d2),
        "w3": bf16(w_d3), "b3": row(b_d3),
        "wc1d": bf16(wc1_deep), "wc1s": bf16(wc1_shallow), "bc1": row(b_c1),
        "wc2": bf16(wc2_pad), "bc2": row(bc2_pad),
    }
    # Full-precision folded weights, kept to bound the quantization error.
    ref_f32 = {
        "w_d0": w_d0, "b_d0": b_d0, "w_d1": w_d1, "b_d1": b_d1,
        "w_d2": w_d2, "b_d2": b_d2, "w_d3": w_d3, "b_d3": b_d3,
        "w_sh": w_sh, "b_sh": b_sh, "w_c1": w_c1, "b_c1": b_c1,
        "w_c2": w_c2, "b_c2": b_c2,
    }
    return params, ref_f32


# ---------------------------------------------------------------------------
# References: exact kernel math (XLA) + fp32 un-quantized reference.
# ---------------------------------------------------------------------------
def _reference_forward_exact(x, p):
    bf = jnp.bfloat16
    f32 = jnp.float32
    h0 = jnp.dot(x.astype(bf), p["w0"], preferred_element_type=f32) + p["b0"]
    h0 = jnp.maximum(h0, 0.0).astype(bf)
    deep, shallow = h0[:, :_DEEP0], h0[:, _DEEP0:]
    h = jnp.dot(deep, p["w1"].astype(bf), preferred_element_type=f32)
    h = jnp.maximum(h * p["s1"] + p["b1"], 0.0).astype(bf)
    h = jnp.dot(h, p["w2"].astype(bf), preferred_element_type=f32)
    h = jnp.maximum(h * p["s2"] + p["b2"], 0.0).astype(bf)
    df = jnp.dot(h, p["w3"], preferred_element_type=f32) + p["b3"]
    df = jnp.maximum(df, 0.0).astype(bf)
    c = (jnp.dot(df, p["wc1d"], preferred_element_type=f32)
         + jnp.dot(shallow, p["wc1s"], preferred_element_type=f32) + p["bc1"])
    c = jnp.maximum(c, 0.0).astype(bf)
    logits = jnp.dot(c, p["wc2"], preferred_element_type=f32) + p["bc2"]
    return logits[:, :_OUT]


def _reference_forward_fp32(x, r):
    def lin(h, w, b, relu=True):
        z = h @ w + b
        return jnp.maximum(z, 0.0) if relu else z
    d = lin(x, r["w_d0"], r["b_d0"])
    d = lin(d, r["w_d1"], r["b_d1"])
    d = lin(d, r["w_d2"], r["b_d2"])
    d = lin(d, r["w_d3"], r["b_d3"])
    s = lin(x, r["w_sh"], r["b_sh"])
    c = lin(jnp.concatenate([d, s], axis=1), r["w_c1"], r["b_c1"])
    return lin(c, r["w_c2"], r["b_c2"], relu=False)


if __name__ == "__main__":
    INPUT_SIZE = 32
    BATCH = 8

    root = jax.random.PRNGKey(0)
    k_params, k_x, k_x2 = jax.random.split(root, 3)

    params, ref_f32 = init_params(k_params, INPUT_SIZE)

    # --- small-batch serving shape ---
    x = jax.random.normal(k_x, (BATCH, INPUT_SIZE), jnp.float32)
    out = jax.block_until_ready(enhanced_spam_classifier_forward(x, params))
    assert out.shape == (BATCH, _OUT), out.shape
    assert out.dtype == jnp.float32
    assert bool(jnp.all(jnp.isfinite(out)))

    ref = jax.block_until_ready(_reference_forward_exact(x, params))
    assert bool(jnp.allclose(out, ref, atol=1e-2, rtol=1e-2))
    # Bound bf16 + int8-weight quantization error against the fp32 model.
    ref32 = jax.block_until_ready(_reference_forward_fp32(x, ref_f32))
    assert bool(jnp.allclose(out, ref32, atol=0.3, rtol=0.1))

    # --- multi-tile batch (exercises the grid, padding and parallel semantics) ---
    x2 = jax.random.normal(k_x2, (384, INPUT_SIZE), jnp.float32)
    out2 = jax.block_until_ready(enhanced_spam_classifier_forward(x2, params))
    assert out2.shape == (384, _OUT), out2.shape
    ref2 = jax.block_until_ready(_reference_forward_exact(x2, params))
    assert bool(jnp.allclose(out2, ref2, atol=1e-2, rtol=1e-2))

    print("KERNEL_OK")
</pallas_src>

<mosaic_0001>
module attributes {stable_mosaic.version = 11 : i64} {
  func.func @_spam_classifier_kernel(%arg0: i32, %arg1: memref<8x32xf32, #tpu.memory_space<vmem>>, %arg2: memref<32x1280xbf16, #tpu.memory_space<vmem>>, %arg3: memref<1x1280xf32, #tpu.memory_space<vmem>>, %arg4: memref<1024x512xi8, #tpu.memory_space<vmem>>, %arg5: memref<1x512xf32, #tpu.memory_space<vmem>>, %arg6: memref<1x512xf32, #tpu.memory_space<vmem>>, %arg7: memref<512x256xi8, #tpu.memory_space<vmem>>, %arg8: memref<1x256xf32, #tpu.memory_space<vmem>>, %arg9: memref<1x256xf32, #tpu.memory_space<vmem>>, %arg10: memref<256x128xbf16, #tpu.memory_space<vmem>>, %arg11: memref<1x128xf32, #tpu.memory_space<vmem>>, %arg12: memref<128x128xbf16, #tpu.memory_space<vmem>>, %arg13: memref<256x128xbf16, #tpu.memory_space<vmem>>, %arg14: memref<1x128xf32, #tpu.memory_space<vmem>>, %arg15: memref<128x128xbf16, #tpu.memory_space<vmem>>, %arg16: memref<1x128xf32, #tpu.memory_space<vmem>>, %arg17: memref<8x128xf32, #tpu.memory_space<vmem>>) attributes {dimension_semantics = [#tpu.dimension_semantics<arbitrary>], iteration_bounds = array<i64: 1>, scalar_prefetch = 0 : i64, scratch_operands = 0 : i64, tpu.core_type = #tpu.core_type<tc>, window_params = [{transform_indices = @transform_0, window_bounds = array<i64: 8, 32>}, {pipeline_mode = #tpu.pipeline_mode<synchronous>, transform_indices = @transform_1, window_bounds = array<i64: 32, 1280>}, {pipeline_mode = #tpu.pipeline_mode<synchronous>, transform_indices = @transform_2, window_bounds = array<i64: 1, 1280>}, {pipeline_mode = #tpu.pipeline_mode<synchronous>, transform_indices = @transform_3, window_bounds = array<i64: 1024, 512>}, {pipeline_mode = #tpu.pipeline_mode<synchronous>, transform_indices = @transform_4, window_bounds = array<i64: 1, 512>}, {pipeline_mode = #tpu.pipeline_mode<synchronous>, transform_indices = @transform_5, window_bounds = array<i64: 1, 512>}, {pipeline_mode = #tpu.pipeline_mode<synchronous>, transform_indices = @transform_6, window_bounds = array<i64: 512, 256>}, {pipeline_mode = #tpu.pipeline_mode<synchronous>, transform_indices = @transform_7, window_bounds = array<i64: 1, 256>}, {pipeline_mode = #tpu.pipeline_mode<synchronous>, transform_indices = @transform_8, window_bounds = array<i64: 1, 256>}, {pipeline_mode = #tpu.pipeline_mode<synchronous>, transform_indices = @transform_9, window_bounds = array<i64: 256, 128>}, {pipeline_mode = #tpu.pipeline_mode<synchronous>, transform_indices = @transform_10, window_bounds = array<i64: 1, 128>}, {pipeline_mode = #tpu.pipeline_mode<synchronous>, transform_indices = @transform_11, window_bounds = array<i64: 128, 128>}, {pipeline_mode = #tpu.pipeline_mode<synchronous>, transform_indices = @transform_12, window_bounds = array<i64: 256, 128>}, {pipeline_mode = #tpu.pipeline_mode<synchronous>, transform_indices = @transform_13, window_bounds = array<i64: 1, 128>}, {pipeline_mode = #tpu.pipeline_mode<synchronous>, transform_indices = @transform_14, window_bounds = array<i64: 128, 128>}, {pipeline_mode = #tpu.pipeline_mode<synchronous>, transform_indices = @transform_15, window_bounds = array<i64: 1, 128>}, {transform_indices = @transform_16, window_bounds = array<i64: 8, 128>}]} {
    %c0 = arith.constant 0 : index
    %c0_0 = arith.constant 0 : index
    %0 = vector.load %arg1[%c0, %c0_0] : memref<8x32xf32, #tpu.memory_space<vmem>>, vector<8x32xf32>
    %1 = arith.truncf %0 : vector<8x32xf32> to vector<8x32xbf16>
    %c0_1 = arith.constant 0 : index
    %c0_2 = arith.constant 0 : index
    %2 = vector.load %arg2[%c0_1, %c0_2] : memref<32x1280xbf16, #tpu.memory_space<vmem>>, vector<32x1280xbf16>
    %cst = arith.constant dense<0.000000e+00> : vector<8x1280xf32>
    %3 = tpu.matmul %1, %2, %cst {dimension_numbers = #tpu.dot_dimension_numbers<[1], [0], [0], [1], [0, 0, 1, 1], [], []>} : vector<8x32xbf16>, vector<32x1280xbf16>, vector<8x1280xf32> -> vector<8x1280xf32>
    %c0_3 = arith.constant 0 : index
    %c0_4 = arith.constant 0 : index
    %4 = vector.load %arg3[%c0_3, %c0_4] : memref<1x1280xf32, #tpu.memory_space<vmem>>, vector<1x1280xf32>
    %5 = vector.broadcast %4 : vector<1x1280xf32> to vector<8x1280xf32>
    %6 = arith.addf %3, %5 : vector<8x1280xf32>
    %cst_5 = arith.constant 0.000000e+00 : f32
    %7 = vector.broadcast %cst_5 : f32 to vector<8x1280xf32>
    %8 = arith.maximumf %6, %7 : vector<8x1280xf32>
    %9 = arith.truncf %8 : vector<8x1280xf32> to vector<8x1280xbf16>
    %10 = vector.extract_strided_slice %9 {offsets = [0, 0], sizes = [8, 1024], strides = [1, 1]} : vector<8x1280xbf16> to vector<8x1024xbf16>
    %11 = vector.extract_strided_slice %9 {offsets = [0, 1024], sizes = [8, 256], strides = [1, 1]} : vector<8x1280xbf16> to vector<8x256xbf16>
    %c0_6 = arith.constant 0 : index
    %c0_7 = arith.constant 0 : index
    %12 = vector.load %arg4[%c0_6, %c0_7] : memref<1024x512xi8, #tpu.memory_space<vmem>>, vector<1024x512xi8>
    %13 = arith.sitofp %12 : vector<1024x512xi8> to vector<1024x512xbf16>
    %cst_8 = arith.constant dense<0.000000e+00> : vector<8x512xf32>
    %14 = tpu.matmul %10, %13, %cst_8 {dimension_numbers = #tpu.dot_dimension_numbers<[1], [0], [0], [1], [0, 0, 1, 1], [], []>} : vector<8x1024xbf16>, vector<1024x512xbf16>, vector<8x512xf32> -> vector<8x512xf32>
    %c0_9 = arith.constant 0 : index
    %c0_10 = arith.constant 0 : index
    %15 = vector.load %arg5[%c0_9, %c0_10] : memref<1x512xf32, #tpu.memory_space<vmem>>, vector<1x512xf32>
    %16 = vector.broadcast %15 : vector<1x512xf32> to vector<8x512xf32>
    %17 = arith.mulf %14, %16 : vector<8x512xf32>
    %c0_11 = arith.constant 0 : index
    %c0_12 = arith.constant 0 : index
    %18 = vector.load %arg6[%c0_11, %c0_12] : memref<1x512xf32, #tpu.memory_space<vmem>>, vector<1x512xf32>
    %19 = vector.broadcast %18 : vector<1x512xf32> to vector<8x512xf32>
    %20 = arith.addf %17, %19 : vector<8x512xf32>
    %cst_13 = arith.constant 0.000000e+00 : f32
    %21 = vector.broadcast %cst_13 : f32 to vector<8x512xf32>
    %22 = arith.maximumf %20, %21 : vector<8x512xf32>
    %23 = arith.truncf %22 : vector<8x512xf32> to vector<8x512xbf16>
    %c0_14 = arith.constant 0 : index
    %c0_15 = arith.constant 0 : index
    %24 = vector.load %arg7[%c0_14, %c0_15] : memref<512x256xi8, #tpu.memory_space<vmem>>, vector<512x256xi8>
    %25 = arith.sitofp %24 : vector<512x256xi8> to vector<512x256xbf16>
    %cst_16 = arith.constant dense<0.000000e+00> : vector<8x256xf32>
    %26 = tpu.matmul %23, %25, %cst_16 {dimension_numbers = #tpu.dot_dimension_numbers<[1], [0], [0], [1], [0, 0, 1, 1], [], []>} : vector<8x512xbf16>, vector<512x256xbf16>, vector<8x256xf32> -> vector<8x256xf32>
    %c0_17 = arith.constant 0 : index
    %c0_18 = arith.constant 0 : index
    %27 = vector.load %arg8[%c0_17, %c0_18] : memref<1x256xf32, #tpu.memory_space<vmem>>, vector<1x256xf32>
    %28 = vector.broadcast %27 : vector<1x256xf32> to vector<8x256xf32>
    %29 = arith.mulf %26, %28 : vector<8x256xf32>
    %c0_19 = arith.constant 0 : index
    %c0_20 = arith.constant 0 : index
    %30 = vector.load %arg9[%c0_19, %c0_20] : memref<1x256xf32, #tpu.memory_space<vmem>>, vector<1x256xf32>
    %31 = vector.broadcast %30 : vector<1x256xf32> to vector<8x256xf32>
    %32 = arith.addf %29, %31 : vector<8x256xf32>
    %cst_21 = arith.constant 0.000000e+00 : f32
    %33 = vector.broadcast %cst_21 : f32 to vector<8x256xf32>
    %34 = arith.maximumf %32, %33 : vector<8x256xf32>
    %35 = arith.truncf %34 : vector<8x256xf32> to vector<8x256xbf16>
    %c0_22 = arith.constant 0 : index
    %c0_23 = arith.constant 0 : index
    %36 = vector.load %arg10[%c0_22, %c0_23] : memref<256x128xbf16, #tpu.memory_space<vmem>>, vector<256x128xbf16>
    %cst_24 = arith.constant dense<0.000000e+00> : vector<8x128xf32>
    %37 = tpu.matmul %35, %36, %cst_24 {dimension_numbers = #tpu.dot_dimension_numbers<[1], [0], [0], [1], [0, 0, 1, 1], [], []>} : vector<8x256xbf16>, vector<256x128xbf16>, vector<8x128xf32> -> vector<8x128xf32>
    %c0_25 = arith.constant 0 : index
    %c0_26 = arith.constant 0 : index
    %38 = vector.load %arg11[%c0_25, %c0_26] : memref<1x128xf32, #tpu.memory_space<vmem>>, vector<1x128xf32>
    %39 = vector.broadcast %38 : vector<1x128xf32> to vector<8x128xf32>
    %40 = arith.addf %37, %39 : vector<8x128xf32>
    %cst_27 = arith.constant 0.000000e+00 : f32
    %41 = vector.broadcast %cst_27 : f32 to vector<8x128xf32>
    %42 = arith.maximumf %40, %41 : vector<8x128xf32>
    %43 = arith.truncf %42 : vector<8x128xf32> to vector<8x128xbf16>
    %c0_28 = arith.constant 0 : index
    %c0_29 = arith.constant 0 : index
    %44 = vector.load %arg12[%c0_28, %c0_29] : memref<128x128xbf16, #tpu.memory_space<vmem>>, vector<128x128xbf16>
    %cst_30 = arith.constant dense<0.000000e+00> : vector<8x128xf32>
    %45 = tpu.matmul %43, %44, %cst_30 {dimension_numbers = #tpu.dot_dimension_numbers<[1], [0], [0], [1], [0, 0, 1, 1], [], []>} : vector<8x128xbf16>, vector<128x128xbf16>, vector<8x128xf32> -> vector<8x128xf32>
    %c0_31 = arith.constant 0 : index
    %c0_32 = arith.constant 0 : index
    %46 = vector.load %arg13[%c0_31, %c0_32] : memref<256x128xbf16, #tpu.memory_space<vmem>>, vector<256x128xbf16>
    %cst_33 = arith.constant dense<0.000000e+00> : vector<8x128xf32>
    %47 = tpu.matmul %11, %46, %cst_33 {dimension_numbers = #tpu.dot_dimension_numbers<[1], [0], [0], [1], [0, 0, 1, 1], [], []>} : vector<8x256xbf16>, vector<256x128xbf16>, vector<8x128xf32> -> vector<8x128xf32>
    %48 = arith.addf %45, %47 : vector<8x128xf32>
    %c0_34 = arith.constant 0 : index
    %c0_35 = arith.constant 0 : index
    %49 = vector.load %arg14[%c0_34, %c0_35] : memref<1x128xf32, #tpu.memory_space<vmem>>, vector<1x128xf32>
    %50 = vector.broadcast %49 : vector<1x128xf32> to vector<8x128xf32>
    %51 = arith.addf %48, %50 : vector<8x128xf32>
    %cst_36 = arith.constant 0.000000e+00 : f32
    %52 = vector.broadcast %cst_36 : f32 to vector<8x128xf32>
    %53 = arith.maximumf %51, %52 : vector<8x128xf32>
    %54 = arith.truncf %53 : vector<8x128xf32> to vector<8x128xbf16>
    %c0_37 = arith.constant 0 : index
    %c0_38 = arith.constant 0 : index
    %55 = vector.load %arg15[%c0_37, %c0_38] : memref<128x128xbf16, #tpu.memory_space<vmem>>, vector<128x128xbf16>
    %cst_39 = arith.constant dense<0.000000e+00> : vector<8x128xf32>
    %56 = tpu.matmul %54, %55, %cst_39 {dimension_numbers = #tpu.dot_dimension_numbers<[1], [0], [0], [1], [0, 0, 1, 1], [], []>} : vector<8x128xbf16>, vector<128x128xbf16>, vector<8x128xf32> -> vector<8x128xf32>
    %c0_40 = arith.constant 0 : index
    %c0_41 = arith.constant 0 : index
    %57 = vector.load %arg16[%c0_40, %c0_41] : memref<1x128xf32, #tpu.memory_space<vmem>>, vector<1x128xf32>
    %58 = vector.broadcast %57 : vector<1x128xf32> to vector<8x128xf32>
    %59 = arith.addf %56, %58 : vector<8x128xf32>
    %c0_42 = arith.constant 0 : index
    %c0_43 = arith.constant 0 : index
    %60 = vector.load %arg17[%c0_42, %c0_43] : memref<8x128xf32, #tpu.memory_space<vmem>>, vector<8x128xf32>
    tpu.vector_store %arg17[%c0_42, %c0_43], %59 {strides = array<i32>} : memref<8x128xf32, #tpu.memory_space<vmem>>, vector<8x128xf32>,
    return
  }
  func.func @transform_0(%arg0: i32) -> (i32, i32) {
    %c0_i32 = arith.constant 0 : i32
    %c0_i32_0 = arith.constant 0 : i32
    return %arg0, %c0_i32 : i32, i32
  }
  func.func @transform_1(%arg0: i32) -> (i32, i32) {
    %c0_i32 = arith.constant 0 : i32
    %c0_i32_0 = arith.constant 0 : i32
    %c0_i32_1 = arith.constant 0 : i32
    return %c0_i32, %c0_i32_0 : i32, i32
  }
  func.func @transform_2(%arg0: i32) -> (i32, i32) {
    %c0_i32 = arith.constant 0 : i32
    %c0_i32_0 = arith.constant 0 : i32
    %c0_i32_1 = arith.constant 0 : i32
    return %c0_i32, %c0_i32_0 : i32, i32
  }
  func.func @transform_3(%arg0: i32) -> (i32, i32) {
    %c0_i32 = arith.constant 0 : i32
    %c0_i32_0 = arith.constant 0 : i32
    %c0_i32_1 = arith.constant 0 : i32
    return %c0_i32, %c0_i32_0 : i32, i32
  }
  func.func @transform_4(%arg0: i32) -> (i32, i32) {
    %c0_i32 = arith.constant 0 : i32
    %c0_i32_0 = arith.constant 0 : i32
    %c0_i32_1 = arith.constant 0 : i32
    return %c0_i32, %c0_i32_0 : i32, i32
  }
  func.func @transform_5(%arg0: i32) -> (i32, i32) {
    %c0_i32 = arith.constant 0 : i32
    %c0_i32_0 = arith.constant 0 : i32
    %c0_i32_1 = arith.constant 0 : i32
    return %c0_i32, %c0_i32_0 : i32, i32
  }
  func.func @transform_6(%arg0: i32) -> (i32, i32) {
    %c0_i32 = arith.constant 0 : i32
    %c0_i32_0 = arith.constant 0 : i32
    %c0_i32_1 = arith.constant 0 : i32
    return %c0_i32, %c0_i32_0 : i32, i32
  }
  func.func @transform_7(%arg0: i32) -> (i32, i32) {
    %c0_i32 = arith.constant 0 : i32
    %c0_i32_0 = arith.constant 0 : i32
    %c0_i32_1 = arith.constant 0 : i32
    return %c0_i32, %c0_i32_0 : i32, i32
  }
  func.func @transform_8(%arg0: i32) -> (i32, i32) {
    %c0_i32 = arith.constant 0 : i32
    %c0_i32_0 = arith.constant 0 : i32
    %c0_i32_1 = arith.constant 0 : i32
    return %c0_i32, %c0_i32_0 : i32, i32
  }
  func.func @transform_9(%arg0: i32) -> (i32, i32) {
    %c0_i32 = arith.constant 0 : i32
    %c0_i32_0 = arith.constant 0 : i32
    %c0_i32_1 = arith.constant 0 : i32
    return %c0_i32, %c0_i32_0 : i32, i32
  }
  func.func @transform_10(%arg0: i32) -> (i32, i32) {
    %c0_i32 = arith.constant 0 : i32
    %c0_i32_0 = arith.constant 0 : i32
    %c0_i32_1 = arith.constant 0 : i32
    return %c0_i32, %c0_i32_0 : i32, i32
  }
  func.func @transform_11(%arg0: i32) -> (i32, i32) {
    %c0_i32 = arith.constant 0 : i32
    %c0_i32_0 = arith.constant 0 : i32
    %c0_i32_1 = arith.constant 0 : i32
    return %c0_i32, %c0_i32_0 : i32, i32
  }
  func.func @transform_12(%arg0: i32) -> (i32, i32) {
    %c0_i32 = arith.constant 0 : i32
    %c0_i32_0 = arith.constant 0 : i32
    %c0_i32_1 = arith.constant 0 : i32
    return %c0_i32, %c0_i32_0 : i32, i32
  }
  func.func @transform_13(%arg0: i32) -> (i32, i32) {
    %c0_i32 = arith.constant 0 : i32
    %c0_i32_0 = arith.constant 0 : i32
    %c0_i32_1 = arith.constant 0 : i32
    return %c0_i32, %c0_i32_0 : i32, i32
  }
  func.func @transform_14(%arg0: i32) -> (i32, i32) {
    %c0_i32 = arith.constant 0 : i32
    %c0_i32_0 = arith.constant 0 : i32
    %c0_i32_1 = arith.constant 0 : i32
    return %c0_i32, %c0_i32_0 : i32, i32
  }
  func.func @transform_15(%arg0: i32) -> (i32, i32) {
    %c0_i32 = arith.constant 0 : i32
    %c0_i32_0 = arith.constant 0 : i32
    %c0_i32_1 = arith.constant 0 : i32
    return %c0_i32, %c0_i32_0 : i32, i32
  }
  func.func @transform_16(%arg0: i32) -> (i32, i32) {
    %c0_i32 = arith.constant 0 : i32
    %c0_i32_0 = arith.constant 0 : i32
    return %arg0, %c0_i32 : i32, i32
  }
}

</mosaic_0001>

<bundles_post_ra>
// kernel: enhanced_spam_classifier_forward.1
= control target key start
LH: loop header
LB: loop body
LE: loop exit
PB: predicated region body
PF: predicated region fallthrough
CT: control target
= control target key end

     0   :  { %s3047_s0 = inlined_call_operand.hbm [shape: f32[8,32], index: 0, kind: input, shape index: {}]   ;;  %s3048_s1 = inlined_call_operand.hbm [shape: bf16[32,1280], index: 1, kind: input, shape index: {}]   ;;  %s3049_s2 = inlined_call_operand.hbm [shape: f32[1,1280], index: 2, kind: input, shape index: {}]   ;;  %s3050_s3 = inlined_call_operand.hbm [shape: s8[1024,512], index: 3, kind: input, shape index: {}]   ;;  %s3051_s4 = inlined_call_operand.vmem [shape: f32[1,512], index: 4, kind: input, shape index: {}]   ;;  %s3052_s5 = inlined_call_operand.hbm [shape: f32[1,512], index: 5, kind: input, shape index: {}]   ;;  %s3053_s6 = inlined_call_operand.hbm [shape: s8[512,256], index: 6, kind: input, shape index: {}]   ;;  %s3054_s7 = inlined_call_operand.vmem [shape: f32[1,256], index: 7, kind: input, shape index: {}]   ;;  %s3055_s8 = inlined_call_operand.vmem [shape: f32[1,256], index: 8, kind: input, shape index: {}]   ;;  %s3056_s9 = inlined_call_operand.hbm [shape: bf16[256,128], index: 9, kind: input, shape index: {}]   ;;  %s3057_s10 = inlined_call_operand.vmem [shape: f32[1,128], index: 10, kind: input, shape index: {}]   ;;  %s3058_s11 = inlined_call_operand.hbm [shape: bf16[128,128], index: 11, kind: input, shape index: {}]   ;;  %s3059_s12 = inlined_call_operand.hbm [shape: bf16[256,128], index: 12, kind: input, shape index: {}]   ;;  %s3060_s13 = inlined_call_operand.vmem [shape: f32[1,128], index: 13, kind: input, shape index: {}]   ;;  %s3061_s14 = inlined_call_operand.hbm [shape: bf16[128,128], index: 14, kind: input, shape index: {}]   ;;  %s3062_s15 = inlined_call_operand.vmem [shape: f32[1,128], index: 15, kind: input, shape index: {}]   ;;  %s3063_s16 = inlined_call_operand.vmem [shape: f32[8,128], index: 16, kind: output, shape index: {}]  }
   0x1   :  { %3065 = sst [smem:[#allocation24_spill]] %s3047_s0 }
   0x2   :  { %21 = vsyncpa [#allocation3], 0 }
   0x3   :  { %22 = vsyncpa [#allocation5], 0 }
   0x4   :  { %23 = vsyncpa [#allocation8], 0 }
   0x5   :  { %24 = vsyncpa [#allocation11], 0 }
   0x6   :  { %25 = vsyncpa [#allocation14], 0 }
   0x7   :  { %26 = vsyncpa [#allocation17], 0  ;;  %s2690_s21 = smov [#allocation4]   ;;  %s2458_s25 = scalar_lea.hbm %s3048_s1, 2560 }
   0x8   :  { %s42_s22 = sshll.u32 %s2690_s21, 4  ;;  %p2459_p0 = scmp.ne.s32.totalorder %s3048_s1, %s2458_s25  ;;  %s43_s22 = int_to_ptr.vmem [resolvable:$true] %s42_s22 }
   0x9   :  { %p2462_p1 = scmp.lt.u32.totalorder %s2458_s25, %s3048_s1 }
   0xb   :  { %p2464_p2 = pnand %p2462_p1, %p2459_p0 }
   0xd   :  { %2467 = shalt.err (!%p2464_p2)
}
   0xe   :  { %s2468_s30 = scalar_lea.vmem %s43_s22, 2560  ;;  %p2473_p4 = scmp.lt.s32.totalorder %s43_s22, %s43_s22 }
   0xf   :  { %p2469_p3 = scmp.ne.s32.totalorder %s43_s22, %s2468_s30  ;;  %p2474_p5 = scmp.lt.s32.totalorder %s2468_s30, %s2468_s30 }
  0x11   :  { %p2475_p6 = por %p2474_p5, %p2473_p4 }
  0x13   :  { %p2476_p7 = pnand %p2475_p6, %p2469_p3 }
  0x15   :  { %2479 = shalt.err (!%p2476_p7)
}
  0x16   :  { %s2691_s0 = smov 640   ;;  %s2692_s17 = smov 40  }
  0x17   :  { %48 = dma.hbm_to_vmem [thread:$0]  %s3048_s1, 2560, %s43_s22, [#allocation5], %s2691_s0, %s2691_s0, %s2692_s17  }
  0x18   :  { %s2693_s20 = smov [#allocation7]   ;;  %s2480_s25 = scalar_lea.hbm %s3050_s3, 16384 }
  0x19   :  { %s64_s21 = sshll.u32 %s2693_s20, 4  ;;  %p2481_p8 = scmp.ne.s32.totalorder %s3050_s3, %s2480_s25  ;;  %s65_s21 = int_to_ptr.vmem [resolvable:$true] %s64_s21 }
  0x1a   :  { %p2484_p9 = scmp.lt.u32.totalorder %s2480_s25, %s3050_s3 }
  0x1c   :  { %p2486_p10 = pnand %p2484_p9, %p2481_p8 }
  0x1e   :  { %2489 = shalt.err (!%p2486_p10)
}
  0x1f   :  { %s2490_s30 = scalar_lea.vmem %s65_s21, 16384  ;;  %p2495_p12 = scmp.lt.s32.totalorder %s65_s21, %s65_s21 }
  0x20   :  { %p2491_p11 = scmp.ne.s32.totalorder %s65_s21, %s2490_s30  ;;  %p2496_p13 = scmp.lt.s32.totalorder %s2490_s30, %s2490_s30 }
  0x22   :  { %p2497_p0 = por %p2496_p13, %p2495_p12 }
  0x24   :  { %p2498_p1 = pnand %p2497_p0, %p2491_p11 }
  0x26   :  { %2501 = shalt.err (!%p2498_p1)
}
  0x27   :  { %s2694_s1 = smov 512   ;;  %s2695_s22 = smov 32  }
  0x28   :  { %70 = dma.hbm_to_vmem [thread:$0]  %s3050_s3, 16384, %s65_s21, [#allocation8], %s2694_s1, %s2694_s1, %s2695_s22  }
  0x29   :  { %s2696_s18 = smov [#allocation10]   ;;  %s2502_s24 = scalar_lea.hbm %s3053_s6, 4096 }
  0x2a   :  { %s88_s19 = sshll.u32 %s2696_s18, 4  ;;  %p2503_p2 = scmp.ne.s32.totalorder %s3053_s6, %s2502_s24  ;;  %s89_s19 = int_to_ptr.vmem [resolvable:$true] %s88_s19 }
  0x2b   :  { %p2506_p3 = scmp.lt.u32.totalorder %s2502_s24, %s3053_s6 }
  0x2d   :  { %p2508_p4 = pnand %p2506_p3, %p2503_p2 }
  0x2f   :  { %2511 = shalt.err (!%p2508_p4)
}
  0x30   :  { %s2512_s29 = scalar_lea.vmem %s89_s19, 4096  ;;  %p2517_p6 = scmp.lt.s32.totalorder %s89_s19, %s89_s19 }
  0x31   :  { %p2513_p5 = scmp.ne.s32.totalorder %s89_s19, %s2512_s29  ;;  %p2518_p7 = scmp.lt.s32.totalorder %s2512_s29, %s2512_s29 }
  0x33   :  { %p2519_p8 = por %p2518_p7, %p2517_p6 }
  0x35   :  { %p2520_p9 = pnand %p2519_p8, %p2513_p5 }
  0x37   :  { %2523 = shalt.err (!%p2520_p9)
}
  0x38   :  { %s2697_s3 = smov 256   ;;  %s2698_s21 = smov 16  }
  0x39   :  { %94 = dma.hbm_to_vmem [thread:$0]  %s3053_s6, 4096, %s89_s19, [#allocation11], %s2697_s3, %s2697_s3, %s2698_s21  }
  0x3a   :  { %s2699_s22 = smov [#allocation13]   ;;  %s2700_s17 = smov [#allocation2]  }
  0x3b   :  { %s118_s0 = sshll.u32 %s2699_s22, 4  ;;  %s33_s18 = sshll.u32 %s2700_s17, 4  ;;  %s119_s0 = int_to_ptr.vmem [resolvable:$true] %s118_s0  ;;  %s34_s18 = int_to_ptr.vmem [resolvable:$true] %s33_s18 }
  0x3c   :  { %s2524_s24 = scalar_lea.hbm %s3058_s11, 1024 }
  0x3d   :  { %p2525_p10 = scmp.ne.s32.totalorder %s3058_s11, %s2524_s24  ;;  %p2528_p11 = scmp.lt.u32.totalorder %s2524_s24, %s3058_s11 }
  0x3f   :  { %p2530_p12 = pnand %p2528_p11, %p2525_p10 }
  0x41   :  { %2533 = shalt.err (!%p2530_p12)
}
  0x42   :  { %s2534_s6 = scalar_lea.vmem %s119_s0, 1024  ;;  %p2539_p0 = scmp.lt.s32.totalorder %s119_s0, %s119_s0 }
  0x43   :  { %p2535_p13 = scmp.ne.s32.totalorder %s119_s0, %s2534_s6  ;;  %p2540_p1 = scmp.lt.s32.totalorder %s2534_s6, %s2534_s6 }
  0x45   :  { %p2541_p2 = por %p2540_p1, %p2539_p0 }
  0x47   :  { %p2542_p3 = pnand %p2541_p2, %p2535_p13 }
  0x49   :  { %2545 = shalt.err (!%p2542_p3)
}
  0x4a   :  { %s2701_s19 = smov 64   ;;  %s2702_s29 = smov 4  }
  0x4b   :  { %124 = dma.hbm_to_vmem [thread:$0]  %s3058_s11, 1024, %s119_s0, [#allocation14], %s2701_s19, %s2701_s19, %s2702_s29  }
  0x4c   :  { %s3066_s22 = sld [smem:[#allocation24_spill]] }
  0x52   :  { %s2546_s17 = scalar_lea.hbm %s3066_s22, 128 }
  0x53   :  { %p2547_p4 = scmp.ne.s32.totalorder %s3066_s22, %s2546_s17  ;;  %p2550_p5 = scmp.lt.u32.totalorder %s2546_s17, %s3066_s22 }
  0x55   :  { %p2552_p6 = pnand %p2550_p5, %p2547_p4 }
  0x57   :  { %2555 = shalt.err (!%p2552_p6)
}
  0x58   :  { %s2556_s26 = scalar_lea.vmem %s34_s18, 128  ;;  %p2561_p8 = scmp.lt.s32.totalorder %s34_s18, %s34_s18 }
  0x59   :  { %p2557_p7 = scmp.ne.s32.totalorder %s34_s18, %s2556_s26  ;;  %p2562_p9 = scmp.lt.s32.totalorder %s2556_s26, %s2556_s26 }
  0x5b   :  { %p2563_p10 = por %p2562_p9, %p2561_p8 }
  0x5d   :  { %p2564_p11 = pnand %p2563_p10, %p2557_p7 }
  0x5f   :  { %2567 = shalt.err (!%p2564_p11)
}
  0x60   :  { %36 = dma.hbm_to_vmem [thread:$0]  %s3066_s22, 128, %s34_s18, [#allocation3]  }
  0x61   :  { %s2703_s27 = smov [#allocation6]   ;;  %s2704_s6 = smov [#allocation9]  }
  0x62   :  { %s55_s28 = sshll.u32 %s2703_s27, 4  ;;  %s79_s3 = sshll.u32 %s2704_s6, 4  ;;  %s56_s28 = int_to_ptr.vmem [resolvable:$true] %s55_s28  ;;  %s80_s3 = int_to_ptr.vmem [resolvable:$true] %s79_s3 }
  0x63   :  { %s2568_s1 = scalar_lea.hbm %s3049_s2, 160 }
  0x64   :  { %p2569_p12 = scmp.ne.s32.totalorder %s3049_s2, %s2568_s1  ;;  %p2572_p13 = scmp.lt.u32.totalorder %s2568_s1, %s3049_s2 }
  0x66   :  { %p2574_p0 = pnand %p2572_p13, %p2569_p12 }
  0x68   :  { %2577 = shalt.err (!%p2574_p0)
}
  0x69   :  { %s2578_s18 = scalar_lea.vmem %s56_s28, 160  ;;  %p2583_p2 = scmp.lt.s32.totalorder %s56_s28, %s56_s28 }
  0x6a   :  { %p2579_p1 = scmp.ne.s32.totalorder %s56_s28, %s2578_s18  ;;  %p2584_p3 = scmp.lt.s32.totalorder %s2578_s18, %s2578_s18 }
  0x6c   :  { %p2585_p4 = por %p2584_p3, %p2583_p2 }
  0x6e   :  { %p2586_p5 = pnand %p2585_p4, %p2579_p1 }
  0x70   :  { %2589 = shalt.err (!%p2586_p5)
}
  0x71   :  { %58 = dma.hbm_to_vmem [thread:$0]  %s3049_s2, 160, %s56_s28, [#allocation5]  }
  0x72   :  { %s2590_s0 = scalar_lea.hbm %s3052_s5, 64 }
  0x73   :  { %p2591_p6 = scmp.ne.s32.totalorder %s3052_s5, %s2590_s0  ;;  %p2594_p7 = scmp.lt.u32.totalorder %s2590_s0, %s3052_s5 }
  0x75   :  { %p2596_p8 = pnand %p2594_p7, %p2591_p6 }
  0x77   :  { %2599 = shalt.err (!%p2596_p8)
}
  0x78   :  { %s2600_s1 = scalar_lea.vmem %s80_s3, 64  ;;  %p2605_p10 = scmp.lt.s32.totalorder %s80_s3, %s80_s3 }
  0x79   :  { %p2601_p9 = scmp.ne.s32.totalorder %s80_s3, %s2600_s1  ;;  %p2606_p11 = scmp.lt.s32.totalorder %s2600_s1, %s2600_s1 }
  0x7b   :  { %p2607_p12 = por %p2606_p11, %p2605_p10 }
  0x7d   :  { %p2608_p13 = pnand %p2607_p12, %p2601_p9 }
  0x7f   :  { %2611 = shalt.err (!%p2608_p13)
}
  0x80   :  { %82 = dma.hbm_to_vmem [thread:$0]  %s3052_s5, 64, %s80_s3, [#allocation8]  }
  0x81   :  { %s2705_s17 = smov [#allocation12]   ;;  %s2706_s23 = smov [#allocation15]  }
  0x82   :  { %s104_s20 = sshll.u32 %s2705_s17, 4  ;;  %s130_s24 = sshll.u32 %s2706_s23, 4  ;;  %s105_s20 = int_to_ptr.vmem [resolvable:$true] %s104_s20  ;;  %s131_s24 = int_to_ptr.vmem [resolvable:$true] %s130_s24 }
  0x83   :  { %s2612_s25 = scalar_lea.hbm %s3056_s9, 2048 }
  0x84   :  { %p2613_p0 = scmp.ne.s32.totalorder %s3056_s9, %s2612_s25  ;;  %p2616_p1 = scmp.lt.u32.totalorder %s2612_s25, %s3056_s9 }
  0x86   :  { %p2618_p2 = pnand %p2616_p1, %p2613_p0 }
  0x88   :  { %2621 = shalt.err (!%p2618_p2)
}
  0x89   :  { %s2622_s5 = scalar_lea.vmem %s105_s20, 2048  ;;  %p2627_p4 = scmp.lt.s32.totalorder %s105_s20, %s105_s20 }
  0x8a   :  { %p2623_p3 = scmp.ne.s32.totalorder %s105_s20, %s2622_s5  ;;  %p2628_p5 = scmp.lt.s32.totalorder %s2622_s5, %s2622_s5 }
  0x8c   :  { %p2629_p6 = por %p2628_p5, %p2627_p4 }
  0x8e   :  { %p2630_p7 = pnand %p2629_p6, %p2623_p3 }
  0x90   :  { %2633 = shalt.err (!%p2630_p7)
}
  0x91   :  { %110 = dma.hbm_to_vmem [thread:$0]  %s3056_s9, 2048, %s105_s20, [#allocation11], %s2701_s19, %s2701_s19, %s2702_s29  }
  0x92   :  { %s2634_s1 = scalar_lea.hbm %s3059_s12, 2048 }
  0x93   :  { %p2635_p8 = scmp.ne.s32.totalorder %s3059_s12, %s2634_s1  ;;  %p2638_p9 = scmp.lt.u32.totalorder %s2634_s1, %s3059_s12 }
  0x95   :  { %p2640_p10 = pnand %p2638_p9, %p2635_p8 }
  0x97   :  { %2643 = shalt.err (!%p2640_p10)
}
  0x98   :  { %s2644_s18 = scalar_lea.vmem %s131_s24, 2048  ;;  %p2649_p12 = scmp.lt.s32.totalorder %s131_s24, %s131_s24 }
  0x99   :  { %p2645_p11 = scmp.ne.s32.totalorder %s131_s24, %s2644_s18  ;;  %p2650_p13 = scmp.lt.s32.totalorder %s2644_s18, %s2644_s18 }
  0x9b   :  { %p2651_p0 = por %p2650_p13, %p2649_p12 }
  0x9d   :  { %p2652_p1 = pnand %p2651_p0, %p2645_p11 }
  0x9f   :  { %2655 = shalt.err (!%p2652_p1)
}
  0xa0   :  { %136 = dma.hbm_to_vmem [thread:$0]  %s3059_s12, 2048, %s131_s24, [#allocation14], %s2701_s19, %s2701_s19, %s2702_s29  }
  0xa1   :  { %s2707_s22 = smov [#allocation16]   ;;  %s2656_s0 = scalar_lea.hbm %s3061_s14, 1024 }
  0xa2   :  { %s144_s25 = sshll.u32 %s2707_s22, 4  ;;  %p2657_p2 = scmp.ne.s32.totalorder %s3061_s14, %s2656_s0  ;;  %s145_s25 = int_to_ptr.vmem [resolvable:$true] %s144_s25 }
  0xa3   :  { %p2660_p3 = scmp.lt.u32.totalorder %s2656_s0, %s3061_s14 }
  0xa5   :  { %p2662_p4 = pnand %p2660_p3, %p2657_p2 }
  0xa7   :  { %2665 = shalt.err (!%p2662_p4)
}
  0xa8   :  { %s2666_s21 = scalar_lea.vmem %s145_s25, 1024  ;;  %p2671_p6 = scmp.lt.s32.totalorder %s145_s25, %s145_s25 }
  0xa9   :  { %p2667_p5 = scmp.ne.s32.totalorder %s145_s25, %s2666_s21  ;;  %p2672_p7 = scmp.lt.s32.totalorder %s2666_s21, %s2666_s21 }
  0xab   :  { %p2673_p8 = por %p2672_p7, %p2671_p6 }
  0xad   :  { %p2674_p9 = pnand %p2673_p8, %p2667_p5 }
  0xaf   :  { %2677 = shalt.err (!%p2674_p9)
}
  0xb0   :  { %150 = dma.hbm_to_vmem [thread:$0]  %s3061_s14, 1024, %s145_s25, [#allocation17], %s2701_s19, %s2701_s19, %s2702_s29  }
  0xb1   :  { %2678 = dma.done.wait [#allocation3], 128  }
  0xb2   :  { %2679 = vsyncadd [#allocation3], 4294967168 }
  0xb3   :  { %2680 = dma.done.wait [#allocation5], 2720  }
  0xb4   :  { %2681 = vsyncadd [#allocation5], 4294964576 }
  0xb5   :  { %2682 = dma.done.wait [#allocation8], 16448  }
  0xb6   :  { %2683 = vsyncadd [#allocation8], 4294950848 }
  0xb7   :  { %2684 = dma.done.wait [#allocation11], 6144  }
  0xb8   :  { %2685 = vsyncadd [#allocation11], 4294961152 }
  0xb9   :  { %2686 = dma.done.wait [#allocation14], 3072  }
  0xba   :  { %2687 = vsyncadd [#allocation14], 4294964224 }
  0xbb   :  { %2688 = dma.done.wait [#allocation17], 1024  }
  0xbc   :  { %2689 = vsyncadd [#allocation17], 4294966272  ;;  %v2708_v0 = vmov 0   ;;  %v2379_v1 = vld [vmem:[#allocation4 + $0x4] ss:$40 sps:$4 sm:$0xff]   ;;  %v184_v5 = vld [vmem:[#allocation2] sm:$0xff] }
  0xbd   :  { %396 = vmatprep.mubr.bf16.mxu0 %v2708_v0  ;;  %437 = vmatprep.mubr.bf16.mxu1 %v2708_v0  ;;  %v2381_v2 = vld [vmem:[#allocation4] ss:$40 sps:$4 sm:$0xff]   ;;  %v2382_v3 = vld [vmem:[#allocation4 + $0x54] ss:$40 sps:$4 sm:$0xff]   ;;  %v2384_v4 = vld [vmem:[#allocation4 + $0x50] ss:$40 sps:$4 sm:$0xff]   ;;  %v185_v9 = vpack.c.bf16 %v184_v5, %v184_v5 }
  0xbe   :  { %364 = vmatprep.subr.bf16.mxu0 %v2379_v1  ;;  %v2385_v6 = vld [vmem:[#allocation4 + $0xc] ss:$40 sps:$4 sm:$0xff]   ;;  %v2387_v7 = vld [vmem:[#allocation4 + $0x8] ss:$40 sps:$4 sm:$0xff]   ;;  %v2388_v8 = vld [vmem:[#allocation4 + $0x5c] ss:$40 sps:$4 sm:$0xff]  }
  0xbf   :  { %365 = vmatpush1.bf16.msra.mxu0 %v2381_v2  ;;  %405 = vmatprep.subr.bf16.mxu1 %v2385_v6  ;;  %v2390_v10 = vld [vmem:[#allocation4 + $0x58] ss:$40 sps:$4 sm:$0xff]   ;;  %v2393_v11 = vld [vmem:[#allocation4 + $0x14] ss:$40 sps:$4 sm:$0xff]   ;;  %vm360_vm0 = vcmask 261120   ;;  %v589_v22 = vld [vmem:[#allocation7] sm:$0xff] }
  0xc0   :  { %366 = vmatprep.subr.bf16.mxu0 %v2382_v3  ;;  %406 = vmatpush1.bf16.msra.mxu1 %v2387_v7  ;;  %v2391_v12 = vld [vmem:[#allocation4 + $0x10] ss:$40 sps:$4 sm:$0xff]   ;;  %v2396_v13 = vld [vmem:[#allocation4 + $0x64] ss:$40 sps:$4 sm:$0xff]   ;;  %v2394_v15 = vld [vmem:[#allocation4 + $0x60] ss:$40 sps:$4 sm:$0xff]   ;;  %v717_v26 = vunpack.c.l.s8.bf16 %v589_v22  ;;  %v721_v32 = vunpack.c.h.s8.bf16 %v589_v22 }
  0xc1   :  { %407 = vmatprep.subr.bf16.mxu1 %v2388_v8  ;;  %v2399_v14 = vld [vmem:[#allocation4 + $0x1c] ss:$40 sps:$4 sm:$0xff]   ;;  %v2397_v16 = vld [vmem:[#allocation4 + $0x18] ss:$40 sps:$4 sm:$0xff]   ;;  %v2405_v18 = vld [vmem:[#allocation4 + $0x6c] ss:$40 sps:$4 sm:$0xff]  }
  0xc2   :  { %v2402_v17 = vld [vmem:[#allocation4 + $0x24] ss:$40 sps:$4 sm:$0xff]   ;;  %v590_v19 = vld [vmem:[#allocation7 + $0x8] sm:$0xff]  ;;  %v2400_v21 = vld [vmem:[#allocation4 + $0x20] ss:$40 sps:$4 sm:$0xff]   ;;  %vm2710_vm1 = vmmov 0  }
  0xc3   :  { %367 = vmatpush1.bf16.msra.mxu0 %v2384_v4  ;;  %v2403_v20 = vld [vmem:[#allocation4 + $0x68] ss:$40 sps:$4 sm:$0xff]   ;;  %v2408_v23 = vld [vmem:[#allocation4 + $0x74] ss:$40 sps:$4 sm:$0xff]   ;;  %v718_v24 = vunpack.c.l.s8.bf16 %v590_v19  ;;  %v722_v28 = vunpack.c.h.s8.bf16 %v590_v19 }
  0xc4   :  { %446 = vmatprep.subr.bf16.mxu0 %v2393_v11  ;;  %408 = vmatpush1.bf16.msra.mxu1 %v2390_v10  ;;  %v592_v25 = vld [vmem:[#allocation7 + $0x18] sm:$0xff]  ;;  %v2406_v27 = vld [vmem:[#allocation4 + $0x70] ss:$40 sps:$4 sm:$0xff]  }
  0xc5   :  { %487 = vmatprep.subr.bf16.mxu1 %v2399_v14  ;;  %v720_v29 = vunpack.c.l.s8.bf16 %v592_v25  ;;  %v591_v30 = vld [vmem:[#allocation7 + $0x10] sm:$0xff]  ;;  %v594_v31 = vld [vmem:[#allocation7 + $0x28] sm:$0xff]  ;;  %v596_v35 = vld [vmem:[#allocation7 + $0x38] sm:$0xff]  ;;  %v724_v37 = vunpack.c.h.s8.bf16 %v592_v25 }
  0xc6   :  { %2172 = vmatmul.mubr.msk.bf16.vlgmr.msra.gmra.mrb[0].mxu0 %vm360_vm0, %v185_v9  ;;  %v719_v33 = vunpack.c.l.s8.bf16 %v591_v30  ;;  %v726_v34 = vunpack.c.l.s8.bf16 %v594_v31  ;;  %v593_v36 = vld [vmem:[#allocation7 + $0x20] sm:$0xff]  ;;  %v595_v39 = vld [vmem:[#allocation7 + $0x30] sm:$0xff]  ;;  %v598_v40 = vld [vmem:[#allocation7 + $0x48] sm:$0xff]  ;;  %v723_v41 = vunpack.c.h.s8.bf16 %v591_v30  ;;  %v730_v42 = vunpack.c.h.s8.bf16 %v594_v31 }
  0xc7   :  { %447 = vmatpush1.bf16.msra.mxu0 %v2391_v12  ;;  %478 = vmatprep.mubr.bf16.mxu0 %v2708_v0  ;;  %v725_v38 = vunpack.c.l.s8.bf16 %v593_v36  ;;  %v728_v43 = vunpack.c.l.s8.bf16 %v596_v35  ;;  %v597_v44 = vld [vmem:[#allocation7 + $0x40] sm:$0xff]  ;;  %v729_v45 = vunpack.c.h.s8.bf16 %v593_v36  ;;  %v727_v46 = vunpack.c.l.s8.bf16 %v595_v39  ;;  %v600_v48 = vld [vmem:[#allocation7 + $0x58] sm:$0xff]  ;;  %v599_v51 = vld [vmem:[#allocation7 + $0x50] sm:$0xff] }
  0xc8   :  { %448 = vmatprep.subr.bf16.mxu0 %v2396_v13  ;;  %2173 = vmatmul.mubr.msk.bf16.vlgmr.msra.gmra.mrb[0].mxu1 %vm360_vm0, %v185_v9  ;;  %v734_v47 = vunpack.c.l.s8.bf16 %v598_v40  ;;  %v732_v49 = vunpack.c.h.s8.bf16 %v596_v35  ;;  %v733_v50 = vunpack.c.l.s8.bf16 %v597_v44  ;;  %v602_v52 = vld [vmem:[#allocation7 + $0x68] sm:$0xff]  ;;  %v731_v53 = vunpack.c.h.s8.bf16 %v595_v39  ;;  %v601_v56 = vld [vmem:[#allocation7 + $0x60] sm:$0xff]  ;;  %v604_v60 = vld [vmem:[#allocation7 + $0x78] sm:$0xff] }
  0xc9   :  { %488 = vmatpush1.bf16.msra.mxu1 %v2397_v16  ;;  %519 = vmatprep.mubr.bf16.mxu1 %v2708_v0  ;;  %v738_v54 = vunpack.c.h.s8.bf16 %v598_v40  ;;  %v736_v55 = vunpack.c.l.s8.bf16 %v600_v48  ;;  %v737_v57 = vunpack.c.h.s8.bf16 %v597_v44  ;;  %v735_v58 = vunpack.c.l.s8.bf16 %v599_v51  ;;  %v603_v63 = vld [vmem:[#allocation7 + $0x70] sm:$0xff]  ;;  %v605_v4 = vld [vmem:[#allocation7 + $0x80] sm:$0xff]  ;;  %v608_v8 = vld [vmem:[#allocation7 + $0x98] sm:$0xff] }
  0xca   :  { %489 = vmatprep.subr.bf16.mxu1 %v2405_v18  ;;  %v742_v59 = vunpack.c.l.s8.bf16 %v602_v52  ;;  %v740_v61 = vunpack.c.h.s8.bf16 %v600_v48  ;;  %v741_v62 = vunpack.c.l.s8.bf16 %v601_v56  ;;  %v739_v1 = vunpack.c.h.s8.bf16 %v599_v51  ;;  %v607_v11 = vld [vmem:[#allocation7 + $0x90] sm:$0xff]  ;;  %v610_v12 = vld [vmem:[#allocation7 + $0xa8] sm:$0xff]  ;;  %v609_v19 = vld [vmem:[#allocation7 + $0xa0] sm:$0xff] }
  0xcb   :  { %449 = vmatpush1.bf16.msra.mxu0 %v2394_v15  ;;  %v746_v2 = vunpack.c.h.s8.bf16 %v602_v52  ;;  %v744_v3 = vunpack.c.l.s8.bf16 %v604_v60  ;;  %v745_v5 = vunpack.c.h.s8.bf16 %v601_v56  ;;  %v743_v6 = vunpack.c.l.s8.bf16 %v603_v63  ;;  %v613_v31 = vld [vmem:[#allocation7 + $0xc0] sm:$0xff]  ;;  %v620_v44 = vld [vmem:[#allocation7 + $0xf8] sm:$0xff]  ;;  %v619_v48 = vld [vmem:[#allocation7 + $0xf0] sm:$0xff] }
  0xcc   :  { %528 = vmatprep.subr.bf16.mxu0 %v2402_v17  ;;  %v749_v10 = vunpack.c.l.s8.bf16 %v605_v4  ;;  %v747_v13 = vunpack.c.h.s8.bf16 %v603_v63  ;;  %v752_v15 = vunpack.c.l.s8.bf16 %v608_v8  ;;  %v753_v16 = vunpack.c.h.s8.bf16 %v605_v4  ;;  %v624_v56 = vld [vmem:[#allocation7 + $0x118] sm:$0xff] }
  0xcd   :  { %490 = vmatpush1.bf16.msra.mxu1 %v2403_v20  ;;  %v751_v17 = vunpack.c.l.s8.bf16 %v607_v11  ;;  %v758_v18 = vunpack.c.l.s8.bf16 %v610_v12  ;;  %v756_v20 = vunpack.c.h.s8.bf16 %v608_v8  ;;  %v757_v22 = vunpack.c.l.s8.bf16 %v609_v19 }
  0xce   :  { %2174 = vmatmul.mubr.msk.bf16.vlgmr.msra.gmra.mrb[4].mxu0 %vm360_vm0, %v185_v9  ;;  %973 = vmatprep.subr.bf16.mxu1 %v718_v24  ;;  %v762_v24 = vunpack.c.h.s8.bf16 %v610_v12  ;;  %v769_v39 = vunpack.c.h.s8.bf16 %v613_v31  ;;  %v780_v52 = vunpack.c.h.s8.bf16 %v620_v44  ;;  %v623_v12 = vld [vmem:[#allocation7 + $0x110] sm:$0xff] }
  0xcf   :  { %529 = vmatpush1.bf16.msra.mxu0 %v2400_v21  ;;  %560 = vmatprep.mubr.bf16.mxu0 %v2708_v0  ;;  %v606_v0 = vld [vmem:[#allocation7 + $0x88] sm:$0xff]  ;;  %v612_v21 = vld [vmem:[#allocation7 + $0xb8] sm:$0xff] }
  0xd0   :  { %530 = vmatprep.subr.bf16.mxu0 %v2408_v23  ;;  %2175 = vmatmul.mubr.msk.bf16.vlgmr.msra.gmra.mrb[4].mxu1 %vm360_vm0, %v185_v9  ;;  %v750_v7 = vunpack.c.l.s8.bf16 %v606_v0  ;;  %v754_v14 = vunpack.c.h.s8.bf16 %v606_v0  ;;  %v755_v23 = vunpack.c.h.s8.bf16 %v607_v11  ;;  %v760_v25 = vunpack.c.l.s8.bf16 %v612_v21  ;;  %v621_v11 = vld [vmem:[#allocation7 + $0x100] sm:$0xff] }
  0xd1   :  { %974 = vmatpush1.bf16.msra.mxu1 %v717_v26  ;;  %v611_v26 = vld [vmem:[#allocation7 + $0xb0] sm:$0xff] }
  0xd2   :  { %975 = vmatprep.subr.bf16.mxu1 %v722_v28  ;;  %v761_v28 = vunpack.c.h.s8.bf16 %v609_v19  ;;  %v763_v35 = vunpack.c.h.s8.bf16 %v611_v26  ;;  %v781_v19 = vunpack.c.l.s8.bf16 %v621_v11 }
  0xd3   :  { %531 = vmatpush1.bf16.msra.mxu0 %v2406_v27  ;;  %v614_v27 = vld [vmem:[#allocation7 + $0xc8] sm:$0xff] }
  0xd4   :  { %1137 = vmatprep.subr.bf16.mxu0 %v720_v29  ;;  %v759_v29 = vunpack.c.l.s8.bf16 %v611_v26  ;;  %v766_v30 = vunpack.c.l.s8.bf16 %v614_v27  ;;  %v770_v36 = vunpack.c.h.s8.bf16 %v614_v27  ;;  %v626_v26 = vld [vmem:[#allocation7 + $0x128] sm:$0xff]  ;;  %v628_v27 = vld [vmem:[#allocation7 + $0x138] sm:$0xff] }
  0xd5   :  { %976 = vmatpush1.bf16.msra.mxu1 %v721_v32  ;;  %v764_v32 = vunpack.c.h.s8.bf16 %v612_v21 }
  0xd6   :  { %2176 = vmatmul.mubr.msk.bf16.vlgmr.msra.gmra.mrb[8].mxu0 %vm360_vm0, %v185_v9  ;;  %977 = vmatprep.subr.bf16.mxu1 %v726_v34  ;;  %v748_v9 = vunpack.c.h.s8.bf16 %v604_v60  ;;  %v765_v34 = vunpack.c.l.s8.bf16 %v613_v31  ;;  %v785_v31 = vunpack.c.h.s8.bf16 %v621_v11 }
  0xd7   :  { %1138 = vmatpush1.bf16.msra.mxu0 %v719_v33  ;;  %v616_v33 = vld [vmem:[#allocation7 + $0xd8] sm:$0xff] }
  0xd8   :  { %1139 = vmatprep.subr.bf16.mxu0 %v724_v37  ;;  %v768_v37 = vunpack.c.l.s8.bf16 %v616_v33 }
  0xd9   :  { %978 = vmatpush1.bf16.msra.mxu1 %v725_v38  ;;  %v615_v38 = vld [vmem:[#allocation7 + $0xd0] sm:$0xff] }
  0xda   :  { %979 = vmatprep.subr.bf16.mxu1 %v730_v42  ;;  %v767_v40 = vunpack.c.l.s8.bf16 %v615_v38  ;;  %v771_v42 = vunpack.c.h.s8.bf16 %v615_v38 }
  0xdb   :  { %1140 = vmatpush1.bf16.msra.mxu0 %v723_v41  ;;  %v772_v41 = vunpack.c.h.s8.bf16 %v616_v33 }
  0xdc   :  { %1141 = vmatprep.subr.bf16.mxu0 %v728_v43  ;;  %v618_v43 = vld [vmem:[#allocation7 + $0xe8] sm:$0xff] }
  0xdd   :  { %980 = vmatpush1.bf16.msra.mxu1 %v729_v45  ;;  %v774_v45 = vunpack.c.l.s8.bf16 %v618_v43  ;;  %v778_v51 = vunpack.c.h.s8.bf16 %v618_v43  ;;  %v630_v43 = vld [vmem:[#allocation7 + $0x148] sm:$0xff] }
  0xde   :  { %981 = vmatprep.subr.bf16.mxu1 %v734_v47  ;;  %v617_v47 = vld [vmem:[#allocation7 + $0xe0] sm:$0xff] }
  0xdf   :  { %1142 = vmatpush1.bf16.msra.mxu0 %v727_v46  ;;  %v776_v46 = vunpack.c.l.s8.bf16 %v620_v44  ;;  %v632_v44 = vld [vmem:[#allocation7 + $0x158] sm:$0xff] }
  0xe0   :  { %1143 = vmatprep.subr.bf16.mxu0 %v732_v49  ;;  %v773_v49 = vunpack.c.l.s8.bf16 %v617_v47 }
  0xe1   :  { %982 = vmatpush1.bf16.msra.mxu1 %v733_v50  ;;  %v775_v50 = vunpack.c.l.s8.bf16 %v619_v48 }
  0xe2   :  { %983 = vmatprep.subr.bf16.mxu1 %v738_v54  ;;  %v779_v54 = vunpack.c.h.s8.bf16 %v619_v48  ;;  %v800_v48 = vunpack.c.l.s8.bf16 %v632_v44 }
  0xe3   :  { %1144 = vmatpush1.bf16.msra.mxu0 %v731_v53  ;;  %v777_v53 = vunpack.c.h.s8.bf16 %v617_v47  ;;  %v798_v47 = vunpack.c.l.s8.bf16 %v630_v43 }
  0xe4   :  { %1145 = vmatprep.subr.bf16.mxu0 %v736_v55  ;;  %v622_v55 = vld [vmem:[#allocation7 + $0x108] sm:$0xff] }
  0xe5   :  { %984 = vmatpush1.bf16.msra.mxu1 %v737_v57  ;;  %v782_v57 = vunpack.c.l.s8.bf16 %v622_v55 }
  0xe6   :  { %985 = vmatprep.subr.bf16.mxu1 %v742_v59  ;;  %v210_v59 = vlaneseq }
  0xe7   :  { %1146 = vmatpush1.bf16.msra.mxu0 %v735_v58  ;;  %v784_v58 = vunpack.c.l.s8.bf16 %v624_v56 }
  0xe8   :  { %1147 = vmatprep.subr.bf16.mxu0 %v740_v61  ;;  %v2933_v60 = vshrl.u32 %v210_v59, 7 }
  0xe9   :  { %986 = vmatpush1.bf16.msra.mxu1 %v741_v62  ;;  %v2938_v62 = vld [vmem:[#allocation6] sm:$0xff] }
  0xea   :  { %987 = vmatprep.subr.bf16.mxu1 %v746_v2  ;;  %v2936_v61 = vsub.s32 0, %v2933_v60  ;;  %v2941_v63 = vsub.s32 1, %v2933_v60 }
  0xeb   :  { %1148 = vmatpush1.bf16.msra.mxu0 %v739_v1  ;;  %v2946_v1 = vsub.s32 3, %v2933_v60 }
  0xec   :  { %1149 = vmatprep.subr.bf16.mxu0 %v744_v3  ;;  %v213_v0 = vrot.slane %v2938_v62, %v2936_v61  ;;  %v217_v2 = vrot.slane %v2938_v62, %v2941_v63 }
  0xed   :  { %988 = vmatpush1.bf16.msra.mxu1 %v745_v5 }
  0xee   :  { %989 = vmatprep.subr.bf16.mxu1 %v750_v7 }
  0xef   :  { %1150 = vmatpush1.bf16.msra.mxu0 %v743_v6  ;;  %v225_v6 = vrot.slane %v2938_v62, %v2946_v1 }
  0xf0   :  { %1151 = vmatprep.subr.bf16.mxu0 %v748_v9 }
  0xf1   :  { %990 = vmatpush1.bf16.msra.mxu1 %v749_v10 }
  0xf2   :  { %991 = vmatprep.subr.bf16.mxu1 %v754_v14 }
  0xf3   :  { %1152 = vmatpush1.bf16.msra.mxu0 %v747_v13 }
  0xf4   :  { %1153 = vmatprep.subr.bf16.mxu0 %v752_v15 }
  0xf5   :  { %992 = vmatpush1.bf16.msra.mxu1 %v753_v16 }
  0xf6   :  { %993 = vmatprep.subr.bf16.mxu1 %v758_v18 }
  0xf7   :  { %1154 = vmatpush1.bf16.msra.mxu0 %v751_v17 }
  0xf8   :  { %1155 = vmatprep.subr.bf16.mxu0 %v756_v20  ;;  %v783_v20 = vunpack.c.l.s8.bf16 %v623_v12 }
  0xf9   :  { %994 = vmatpush1.bf16.msra.mxu1 %v757_v22 }
  0xfa   :  { %995 = vmatprep.subr.bf16.mxu1 %v762_v24  ;;  %v788_v24 = vunpack.c.h.s8.bf16 %v624_v56  ;;  %v634_v56 = vld [vmem:[#allocation7 + $0x168] sm:$0xff] }
  0xfb   :  { %1156 = vmatpush1.bf16.msra.mxu0 %v755_v23  ;;  %v786_v23 = vunpack.c.h.s8.bf16 %v622_v55 }
  0xfc   :  { %1157 = vmatprep.subr.bf16.mxu0 %v760_v25 }
  0xfd   :  { %996 = vmatpush1.bf16.msra.mxu1 %v761_v28 }
  0xfe   :  { %997 = vmatprep.subr.bf16.mxu1 %v766_v30 }
  0xff   :  { %1158 = vmatpush1.bf16.msra.mxu0 %v759_v29 }
 0x100   :  { %1159 = vmatprep.subr.bf16.mxu0 %v764_v32  ;;  %v787_v32 = vunpack.c.h.s8.bf16 %v623_v12  ;;  %v638_v12 = vld [vmem:[#allocation7 + $0x188] sm:$0xff] }
 0x101   :  { %998 = vmatpush1.bf16.msra.mxu1 %v765_v34  ;;  %v790_v34 = vunpack.c.l.s8.bf16 %v626_v26 }
 0x102   :  { %999 = vmatprep.subr.bf16.mxu1 %v770_v36  ;;  %v625_v36 = vld [vmem:[#allocation7 + $0x120] sm:$0xff] }
 0x103   :  { %1160 = vmatpush1.bf16.msra.mxu0 %v763_v35  ;;  %v792_v35 = vunpack.c.l.s8.bf16 %v628_v27 }
 0x104   :  { %1161 = vmatprep.subr.bf16.mxu0 %v768_v37  ;;  %v627_v37 = vld [vmem:[#allocation7 + $0x130] sm:$0xff] }
 0x105   :  { %1000 = vmatpush1.bf16.msra.mxu1 %v769_v39  ;;  %v789_v39 = vunpack.c.l.s8.bf16 %v625_v36 }
 0x106   :  { %1001 = vmatprep.subr.bf16.mxu1 %v774_v45  ;;  %v793_v45 = vunpack.c.h.s8.bf16 %v625_v36 }
 0x107   :  { %1162 = vmatpush1.bf16.msra.mxu0 %v767_v40  ;;  %v791_v40 = vunpack.c.l.s8.bf16 %v627_v37 }
 0x108   :  { %1163 = vmatprep.subr.bf16.mxu0 %v772_v41  ;;  %v794_v41 = vunpack.c.h.s8.bf16 %v626_v26  ;;  %v644_v26 = vld [vmem:[#allocation7 + $0x1b8] sm:$0xff] }
 0x109   :  { %1002 = vmatpush1.bf16.msra.mxu1 %v773_v49  ;;  %v629_v49 = vld [vmem:[#allocation7 + $0x140] sm:$0xff] }
 0x10a   :  { %1003 = vmatprep.subr.bf16.mxu1 %v778_v51  ;;  %v797_v51 = vunpack.c.l.s8.bf16 %v629_v49 }
 0x10b   :  { %1164 = vmatpush1.bf16.msra.mxu0 %v771_v42  ;;  %v796_v42 = vunpack.c.h.s8.bf16 %v628_v27 }
 0x10c   :  { %1165 = vmatprep.subr.bf16.mxu0 %v776_v46  ;;  %v795_v46 = vunpack.c.h.s8.bf16 %v627_v37 }
 0x10d   :  { %1004 = vmatpush1.bf16.msra.mxu1 %v777_v53  ;;  %v802_v53 = vunpack.c.h.s8.bf16 %v630_v43 }
 0x10e   :  { %1014 = vmatprep.subr.bf16.mxu1 %v782_v57  ;;  %v636_v57 = vld [vmem:[#allocation7 + $0x178] sm:$0xff] }
 0x10f   :  { %1166 = vmatpush1.bf16.msra.mxu0 %v775_v50  ;;  %v631_v50 = vld [vmem:[#allocation7 + $0x150] sm:$0xff]  ;;  %v812_v11 = vunpack.c.h.s8.bf16 %v636_v57 }
 0x110   :  { %1167 = vmatprep.subr.bf16.mxu0 %v780_v52  ;;  %v799_v52 = vunpack.c.l.s8.bf16 %v631_v50  ;;  %v803_v59 = vunpack.c.h.s8.bf16 %v631_v50 }
 0x113   :  { %1168 = vmatpush1.bf16.msra.mxu0 %v779_v54  ;;  %v804_v54 = vunpack.c.h.s8.bf16 %v632_v44 }
 0x114   :  { %1178 = vmatprep.subr.bf16.mxu0 %v784_v58  ;;  %v801_v58 = vunpack.c.h.s8.bf16 %v629_v49 }
 0x199   :  { %v398_v3 = vpop.f32.mrb[0].mxu0 }
 0x19a   :  { %v399_v4 = vadd.f32 %v398_v3, %v213_v0  ;;  %v400_v5 = vpop.f32.mrb[1].mxu0  ;;  %v808_v3 = vunpack.c.l.s8.bf16 %v636_v57 }
 0x19b   :  { %v401_v7 = vadd.f32 %v400_v5, %v217_v2  ;;  %v402_v8 = vpop.f32.mrb[2].mxu0  ;;  %v2952_v13 = vpop.f32.mrb[0].mxu1  ;;  %v806_v2 = vunpack.c.l.s8.bf16 %v634_v56  ;;  %v635_v5 = vld [vmem:[#allocation7 + $0x170] sm:$0xff] }
 0x19c   :  { %v569_v9 = vmax.f32 %v399_v4, 0.0  ;;  %v403_v10 = vpop.f32.mrb[3].mxu0  ;;  %v441_v15 = vpop.f32.mrb[1].mxu1  ;;  %v633_v4 = vld [vmem:[#allocation7 + $0x160] sm:$0xff] }
 0x19d   :  { %v570_v14 = vmax.f32 %v401_v7, 0.0  ;;  %v442_v16 = vadd.f32 %v441_v15, %v225_v6  ;;  %v443_v17 = vpop.f32.mrb[2].mxu1  ;;  %v805_v8 = vunpack.c.l.s8.bf16 %v633_v4  ;;  %v810_v10 = vunpack.c.h.s8.bf16 %v634_v56 }
 0x19e   :  { %v444_v21 = vpop.f32.mrb[3].mxu1  ;;  %v579_v22 = vpack.c.bf16 %v569_v9, %v569_v9  ;;  %v807_v9 = vunpack.c.l.s8.bf16 %v635_v5  ;;  %v809_v15 = vunpack.c.h.s8.bf16 %v633_v4  ;;  %v814_v17 = vunpack.c.l.s8.bf16 %v638_v12  ;;  %v651_v4 = vld [vmem:[#allocation7 + $0x1f0] sm:$0xff] }
 0x19f   :  { %v580_v18 = vpack.c.bf16 %v570_v14, %v570_v14  ;;  %v572_v25 = vmax.f32 %v442_v16, 0.0  ;;  %v640_v14 = vld [vmem:[#allocation7 + $0x198] sm:$0xff]  ;;  %v811_v16 = vunpack.c.h.s8.bf16 %v635_v5 }
 0x1a1   :  { %1005 = vmatprep.mubr.bf16.mxu1 %v580_v18  ;;  %1169 = vmatprep.mubr.bf16.mxu0 %v580_v18  ;;  %v2954_v28 = vpop.f32.mrb[4].mxu0  ;;  %v582_v29 = vpack.c.bf16 %v572_v25, %v572_v25  ;;  %v816_v18 = vunpack.c.l.s8.bf16 %v640_v14  ;;  %v642_v25 = vld [vmem:[#allocation7 + $0x1a8] sm:$0xff] }
 0x1a2   :  { %1006 = vmatmul.mubr.bf16.vlgmr.msra.gmra.mrb[8].mxu1 %v579_v22  ;;  %1170 = vmatmul.mubr.bf16.vlgmr.msra.gmra.mrb[12].mxu0 %v579_v22  ;;  %v2956_v30 = vpop.f32.mrb[5].mxu0  ;;  %v826_v37 = vunpack.c.h.s8.bf16 %v642_v25 }
 0x1a3   :  { %1015 = vmatpush1.bf16.msra.mxu1 %v781_v19  ;;  %1179 = vmatpush1.bf16.msra.mxu0 %v783_v20  ;;  %v484_v33 = vpop.f32.mrb[6].mxu0  ;;  %v2958_v55 = vpop.f32.mrb[4].mxu1  ;;  %v637_v19 = vld [vmem:[#allocation7 + $0x180] sm:$0xff]  ;;  %v639_v20 = vld [vmem:[#allocation7 + $0x190] sm:$0xff] }
 0x1a4   :  { %1016 = vmatprep.subr.bf16.mxu1 %v786_v23  ;;  %1180 = vmatprep.subr.bf16.mxu0 %v788_v24  ;;  %v485_v38 = vpop.f32.mrb[7].mxu0  ;;  %v2960_v0 = vpop.f32.mrb[5].mxu1  ;;  %v813_v21 = vunpack.c.l.s8.bf16 %v637_v19  ;;  %v815_v22 = vunpack.c.l.s8.bf16 %v639_v20  ;;  %v818_v23 = vunpack.c.h.s8.bf16 %v638_v12  ;;  %v820_v24 = vunpack.c.h.s8.bf16 %v640_v14  ;;  %v641_v33 = vld [vmem:[#allocation7 + $0x1a0] sm:$0xff]  ;;  %v656_v12 = vld [vmem:[#allocation7 + $0x218] sm:$0xff] }
 0x1a5   :  { %1046 = vmatprep.mubr.bf16.mxu1 %v582_v29  ;;  %1210 = vmatprep.mubr.bf16.mxu0 %v582_v29  ;;  %v525_v6 = vpop.f32.mrb[6].mxu1  ;;  %v817_v27 = vunpack.c.h.s8.bf16 %v637_v19  ;;  %v819_v29 = vunpack.c.h.s8.bf16 %v639_v20  ;;  %v828_v38 = vunpack.c.h.s8.bf16 %v644_v26  ;;  %v653_v19 = vld [vmem:[#allocation7 + $0x200] sm:$0xff]  ;;  %v655_v20 = vld [vmem:[#allocation7 + $0x210] sm:$0xff] }
 0x1a6   :  { %v526_v7 = vpop.f32.mrb[7].mxu1 }
 0x1a7   :  { %1017 = vmatpush1.bf16.msra.mxu1 %v785_v31  ;;  %1181 = vmatpush1.bf16.msra.mxu0 %v787_v32  ;;  %v822_v31 = vunpack.c.l.s8.bf16 %v642_v25  ;;  %v824_v32 = vunpack.c.l.s8.bf16 %v644_v26  ;;  %v852_v25 = vunpack.c.h.s8.bf16 %v656_v12  ;;  %v658_v26 = vld [vmem:[#allocation7 + $0x228] sm:$0xff] }
 0x1a8   :  { %1018 = vmatprep.subr.bf16.mxu1 %v790_v34  ;;  %1182 = vmatprep.subr.bf16.mxu0 %v792_v35  ;;  %v643_v34 = vld [vmem:[#allocation7 + $0x1b0] sm:$0xff]  ;;  %v821_v35 = vunpack.c.l.s8.bf16 %v641_v33 }
 0x1a9   :  { %v823_v36 = vunpack.c.l.s8.bf16 %v643_v34 }
 0x1ab   :  { %1019 = vmatpush1.bf16.msra.mxu1 %v789_v39  ;;  %1183 = vmatpush1.bf16.msra.mxu0 %v791_v40  ;;  %v646_v39 = vld [vmem:[#allocation7 + $0x1c8] sm:$0xff]  ;;  %v648_v40 = vld [vmem:[#allocation7 + $0x1d8] sm:$0xff] }
 0x1ac   :  { %1020 = vmatprep.subr.bf16.mxu1 %v794_v41  ;;  %1184 = vmatprep.subr.bf16.mxu0 %v796_v42  ;;  %v825_v41 = vunpack.c.h.s8.bf16 %v641_v33  ;;  %v827_v42 = vunpack.c.h.s8.bf16 %v643_v34  ;;  %v830_v43 = vunpack.c.l.s8.bf16 %v646_v39  ;;  %v832_v44 = vunpack.c.l.s8.bf16 %v648_v40 }
 0x1ad   :  { %v834_v50 = vunpack.c.h.s8.bf16 %v646_v39  ;;  %v851_v33 = vunpack.c.h.s8.bf16 %v655_v20 }
 0x1af   :  { %1021 = vmatpush1.bf16.msra.mxu1 %v793_v45  ;;  %1185 = vmatpush1.bf16.msra.mxu0 %v795_v46  ;;  %v645_v45 = vld [vmem:[#allocation7 + $0x1c0] sm:$0xff]  ;;  %v647_v46 = vld [vmem:[#allocation7 + $0x1d0] sm:$0xff] }
 0x1b0   :  { %1022 = vmatprep.subr.bf16.mxu1 %v798_v47  ;;  %1186 = vmatprep.subr.bf16.mxu0 %v800_v48  ;;  %v2963_v47 = vsub.s32 2, %v2933_v60  ;;  %v829_v48 = vunpack.c.l.s8.bf16 %v645_v45  ;;  %v831_v49 = vunpack.c.l.s8.bf16 %v647_v46  ;;  %v833_v57 = vunpack.c.h.s8.bf16 %v645_v45  ;;  %v662_v45 = vld [vmem:[#allocation7 + $0x248] sm:$0xff] }
 0x1b2   :  { %v221_v56 = vrot.slane %v2938_v62, %v2963_v47 }
 0x1b3   :  { %1023 = vmatpush1.bf16.msra.mxu1 %v797_v51  ;;  %1187 = vmatpush1.bf16.msra.mxu0 %v799_v52  ;;  %v836_v51 = vunpack.c.h.s8.bf16 %v648_v40  ;;  %v650_v52 = vld [vmem:[#allocation7 + $0x1e8] sm:$0xff] }
 0x1b4   :  { %1024 = vmatprep.subr.bf16.mxu1 %v802_v53  ;;  %1188 = vmatprep.subr.bf16.mxu0 %v804_v54  ;;  %v652_v53 = vld [vmem:[#allocation7 + $0x1f8] sm:$0xff]  ;;  %v232_v54 = vsub.s32 5, %v2933_v60  ;;  %v440_v6 = vadd.f32 %v2952_v13, %v221_v56 }
 0x1b6   :  { %v233_v5 = vrot.slane %v2938_v62, %v232_v54 }
 0x1b7   :  { %1025 = vmatpush1.bf16.msra.mxu1 %v801_v58  ;;  %1189 = vmatpush1.bf16.msra.mxu0 %v803_v59  ;;  %v835_v58 = vunpack.c.h.s8.bf16 %v647_v46  ;;  %v838_v59 = vunpack.c.l.s8.bf16 %v650_v52  ;;  %v664_v46 = vld [vmem:[#allocation7 + $0x258] sm:$0xff] }
 0x1b8   :  { %1026 = vmatprep.subr.bf16.mxu1 %v806_v2  ;;  %1190 = vmatprep.subr.bf16.mxu0 %v808_v3  ;;  %v840_v2 = vunpack.c.l.s8.bf16 %v652_v53  ;;  %v649_v3 = vld [vmem:[#allocation7 + $0x1e0] sm:$0xff]  ;;  %v483_v14 = vadd.f32 %v2956_v30, %v233_v5 }
 0x1b9   :  { %v837_v7 = vunpack.c.l.s8.bf16 %v649_v3 }
 0x1bb   :  { %1027 = vmatpush1.bf16.msra.mxu1 %v805_v8  ;;  %1191 = vmatpush1.bf16.msra.mxu0 %v807_v9  ;;  %v839_v8 = vunpack.c.l.s8.bf16 %v651_v4  ;;  %v842_v9 = vunpack.c.h.s8.bf16 %v650_v52  ;;  %v661_v52 = vld [vmem:[#allocation7 + $0x240] sm:$0xff] }
 0x1bc   :  { %1028 = vmatprep.subr.bf16.mxu1 %v810_v10  ;;  %1192 = vmatprep.subr.bf16.mxu0 %v812_v11  ;;  %v844_v10 = vunpack.c.h.s8.bf16 %v652_v53  ;;  %v654_v11 = vld [vmem:[#allocation7 + $0x208] sm:$0xff]  ;;  %v663_v53 = vld [vmem:[#allocation7 + $0x250] sm:$0xff]  ;;  %v861_v54 = vunpack.c.l.s8.bf16 %v661_v52 }
 0x1bd   :  { %v846_v13 = vunpack.c.l.s8.bf16 %v654_v11  ;;  %v850_v30 = vunpack.c.h.s8.bf16 %v654_v11  ;;  %v863_v56 = vunpack.c.l.s8.bf16 %v663_v53 }
 0x1bf   :  { %1029 = vmatpush1.bf16.msra.mxu1 %v809_v15  ;;  %1193 = vmatpush1.bf16.msra.mxu0 %v811_v16  ;;  %v571_v15 = vmax.f32 %v440_v6, 0.0  ;;  %v841_v16 = vunpack.c.h.s8.bf16 %v649_v3  ;;  %v865_v3 = vunpack.c.h.s8.bf16 %v661_v52 }
 0x1c0   :  { %1030 = vmatprep.subr.bf16.mxu1 %v814_v17  ;;  %1194 = vmatprep.subr.bf16.mxu0 %v816_v18  ;;  %v843_v17 = vunpack.c.h.s8.bf16 %v651_v4  ;;  %v848_v18 = vunpack.c.l.s8.bf16 %v656_v12  ;;  %v867_v4 = vunpack.c.h.s8.bf16 %v663_v53 }
 0x1c3   :  { %1031 = vmatpush1.bf16.msra.mxu1 %v813_v21  ;;  %1195 = vmatpush1.bf16.msra.mxu0 %v815_v22  ;;  %v574_v21 = vmax.f32 %v483_v14, 0.0  ;;  %v581_v22 = vpack.c.bf16 %v571_v15, %v571_v15  ;;  %v670_v14 = vld [vmem:[#allocation7 + $0x288] sm:$0xff]  ;;  %v672_v15 = vld [vmem:[#allocation7 + $0x298] sm:$0xff] }
 0x1c4   :  { %1032 = vmatprep.subr.bf16.mxu1 %v818_v23  ;;  %1196 = vmatprep.subr.bf16.mxu0 %v820_v24  ;;  %v845_v23 = vunpack.c.l.s8.bf16 %v653_v19  ;;  %v847_v24 = vunpack.c.l.s8.bf16 %v655_v20  ;;  %v671_v20 = vld [vmem:[#allocation7 + $0x290] sm:$0xff] }
 0x1c7   :  { %1033 = vmatpush1.bf16.msra.mxu1 %v817_v27  ;;  %1197 = vmatpush1.bf16.msra.mxu0 %v819_v29  ;;  %v660_v27 = vld [vmem:[#allocation7 + $0x238] sm:$0xff]  ;;  %v584_v29 = vpack.c.bf16 %v574_v21, %v574_v21 }
 0x1c8   :  { %1034 = vmatprep.subr.bf16.mxu1 %v822_v31  ;;  %1198 = vmatprep.subr.bf16.mxu0 %v824_v32  ;;  %v2971_v31 = vpop.f32.mrb[8].mxu0  ;;  %v849_v32 = vunpack.c.h.s8.bf16 %v653_v19  ;;  %v669_v19 = vld [vmem:[#allocation7 + $0x280] sm:$0xff] }
 0x1c9   :  { %v2973_v34 = vpop.f32.mrb[9].mxu0  ;;  %v877_v21 = vunpack.c.l.s8.bf16 %v669_v19 }
 0x1ca   :  { %v566_v39 = vpop.f32.mrb[10].mxu0 }
 0x1cb   :  { %1035 = vmatpush1.bf16.msra.mxu1 %v821_v35  ;;  %1199 = vmatpush1.bf16.msra.mxu0 %v823_v36  ;;  %v854_v35 = vunpack.c.l.s8.bf16 %v658_v26  ;;  %v856_v36 = vunpack.c.l.s8.bf16 %v660_v27  ;;  %v567_v40 = vpop.f32.mrb[11].mxu0 }
 0x1cc   :  { %1036 = vmatprep.subr.bf16.mxu1 %v826_v37  ;;  %1200 = vmatprep.subr.bf16.mxu0 %v828_v38  ;;  %v657_v37 = vld [vmem:[#allocation7 + $0x220] sm:$0xff]  ;;  %v659_v38 = vld [vmem:[#allocation7 + $0x230] sm:$0xff]  ;;  %v678_v40 = vld [vmem:[#allocation7 + $0x2c8] sm:$0xff] }
 0x1cd   :  { %v898_v52 = vunpack.c.h.s8.bf16 %v678_v40 }
 0x1cf   :  { %1037 = vmatpush1.bf16.msra.mxu1 %v825_v41  ;;  %1201 = vmatpush1.bf16.msra.mxu0 %v827_v42  ;;  %v853_v41 = vunpack.c.l.s8.bf16 %v657_v37  ;;  %v855_v42 = vunpack.c.l.s8.bf16 %v659_v38 }
 0x1d0   :  { %1038 = vmatprep.subr.bf16.mxu1 %v830_v43  ;;  %1202 = vmatprep.subr.bf16.mxu0 %v832_v44  ;;  %v858_v43 = vunpack.c.h.s8.bf16 %v658_v26  ;;  %v860_v44 = vunpack.c.h.s8.bf16 %v660_v27  ;;  %v881_v26 = vunpack.c.h.s8.bf16 %v669_v19  ;;  %v883_v27 = vunpack.c.h.s8.bf16 %v671_v20  ;;  %v685_v19 = vld [vmem:[#allocation7 + $0x300] sm:$0xff] }
 0x1d3   :  { %1039 = vmatpush1.bf16.msra.mxu1 %v829_v48  ;;  %1203 = vmatpush1.bf16.msra.mxu0 %v831_v49  ;;  %v857_v48 = vunpack.c.h.s8.bf16 %v657_v37  ;;  %v859_v49 = vunpack.c.h.s8.bf16 %v659_v38 }
 0x1d4   :  { %1040 = vmatprep.subr.bf16.mxu1 %v834_v50  ;;  %1204 = vmatprep.subr.bf16.mxu0 %v836_v51  ;;  %v862_v50 = vunpack.c.l.s8.bf16 %v662_v45  ;;  %v864_v51 = vunpack.c.l.s8.bf16 %v664_v46 }
 0x1d7   :  { %1041 = vmatpush1.bf16.msra.mxu1 %v833_v57  ;;  %1205 = vmatpush1.bf16.msra.mxu0 %v835_v58  ;;  %v866_v57 = vunpack.c.h.s8.bf16 %v662_v45  ;;  %v868_v58 = vunpack.c.h.s8.bf16 %v664_v46  ;;  %v677_v46 = vld [vmem:[#allocation7 + $0x2c0] sm:$0xff] }
 0x1d8   :  { %1042 = vmatprep.subr.bf16.mxu1 %v838_v59  ;;  %1206 = vmatprep.subr.bf16.mxu0 %v840_v2  ;;  %v666_v59 = vld [vmem:[#allocation7 + $0x268] sm:$0xff]  ;;  %v668_v2 = vld [vmem:[#allocation7 + $0x278] sm:$0xff] }
 0x1d9   :  { %v870_v5 = vunpack.c.l.s8.bf16 %v666_v59  ;;  %v872_v6 = vunpack.c.l.s8.bf16 %v668_v2  ;;  %v874_v11 = vunpack.c.h.s8.bf16 %v666_v59  ;;  %v876_v12 = vunpack.c.h.s8.bf16 %v668_v2 }
 0x1da   :  { %v897_v59 = vunpack.c.h.s8.bf16 %v677_v46 }
 0x1db   :  { %1043 = vmatpush1.bf16.msra.mxu1 %v837_v7  ;;  %1207 = vmatpush1.bf16.msra.mxu0 %v839_v8  ;;  %v665_v7 = vld [vmem:[#allocation7 + $0x260] sm:$0xff]  ;;  %v667_v8 = vld [vmem:[#allocation7 + $0x270] sm:$0xff] }
 0x1dc   :  { %1044 = vmatprep.subr.bf16.mxu1 %v842_v9  ;;  %1208 = vmatprep.subr.bf16.mxu0 %v844_v10  ;;  %v869_v9 = vunpack.c.l.s8.bf16 %v665_v7  ;;  %v871_v10 = vunpack.c.l.s8.bf16 %v667_v8 }
 0x1df   :  { %1045 = vmatpush1.bf16.msra.mxu1 %v841_v16  ;;  %1209 = vmatpush1.bf16.msra.mxu0 %v843_v17  ;;  %v873_v16 = vunpack.c.h.s8.bf16 %v665_v7  ;;  %v875_v17 = vunpack.c.h.s8.bf16 %v667_v8 }
 0x1e0   :  { %1055 = vmatprep.subr.bf16.mxu1 %v846_v13  ;;  %1219 = vmatprep.subr.bf16.mxu0 %v848_v18  ;;  %v878_v13 = vunpack.c.l.s8.bf16 %v670_v14  ;;  %v880_v18 = vunpack.c.l.s8.bf16 %v672_v15 }
 0x1e2   :  { %1047 = vmatmul.mubr.bf16.vlgmr.msra.gmra.mrb[8].mxu1 %v581_v22  ;;  %1211 = vmatmul.mubr.bf16.vlgmr.msra.gmra.mrb[12].mxu0 %v581_v22  ;;  %v879_v22 = vunpack.c.l.s8.bf16 %v671_v20  ;;  %v687_v20 = vld [vmem:[#allocation7 + $0x310] sm:$0xff] }
 0x1e3   :  { %1056 = vmatpush1.bf16.msra.mxu1 %v845_v23  ;;  %1220 = vmatpush1.bf16.msra.mxu0 %v847_v24  ;;  %v882_v23 = vunpack.c.h.s8.bf16 %v670_v14  ;;  %v884_v24 = vunpack.c.h.s8.bf16 %v672_v15  ;;  %v686_v14 = vld [vmem:[#allocation7 + $0x308] sm:$0xff]  ;;  %v688_v15 = vld [vmem:[#allocation7 + $0x318] sm:$0xff] }
 0x1e4   :  { %1057 = vmatprep.subr.bf16.mxu1 %v850_v30  ;;  %1221 = vmatprep.subr.bf16.mxu0 %v852_v25  ;;  %v674_v30 = vld [vmem:[#allocation7 + $0x2a8] sm:$0xff]  ;;  %v676_v25 = vld [vmem:[#allocation7 + $0x2b8] sm:$0xff] }
 0x1e5   :  { %1087 = vmatprep.mubr.bf16.mxu1 %v584_v29  ;;  %1251 = vmatprep.mubr.bf16.mxu0 %v584_v29  ;;  %v886_v29 = vunpack.c.l.s8.bf16 %v674_v30  ;;  %v890_v38 = vunpack.c.h.s8.bf16 %v674_v30  ;;  %v892_v39 = vunpack.c.h.s8.bf16 %v676_v25  ;;  %v916_v30 = vunpack.c.h.s8.bf16 %v688_v15 }
 0x1e7   :  { %1058 = vmatpush1.bf16.msra.mxu1 %v849_v32  ;;  %1222 = vmatpush1.bf16.msra.mxu0 %v851_v33  ;;  %v888_v32 = vunpack.c.l.s8.bf16 %v676_v25  ;;  %v673_v33 = vld [vmem:[#allocation7 + $0x2a0] sm:$0xff]  ;;  %v690_v25 = vld [vmem:[#allocation7 + $0x328] sm:$0xff] }
 0x1e8   :  { %1059 = vmatprep.subr.bf16.mxu1 %v854_v35  ;;  %1223 = vmatprep.subr.bf16.mxu0 %v856_v36  ;;  %v675_v35 = vld [vmem:[#allocation7 + $0x2b0] sm:$0xff]  ;;  %v885_v36 = vunpack.c.l.s8.bf16 %v673_v33 }
 0x1e9   :  { %v887_v37 = vunpack.c.l.s8.bf16 %v675_v35 }
 0x1eb   :  { %1060 = vmatpush1.bf16.msra.mxu1 %v853_v41  ;;  %1224 = vmatpush1.bf16.msra.mxu0 %v855_v42  ;;  %v680_v41 = vld [vmem:[#allocation7 + $0x2d8] sm:$0xff]  ;;  %v889_v42 = vunpack.c.h.s8.bf16 %v673_v33  ;;  %v918_v33 = vunpack.c.l.s8.bf16 %v690_v25 }
 0x1ec   :  { %1061 = vmatprep.subr.bf16.mxu1 %v858_v43  ;;  %1225 = vmatprep.subr.bf16.mxu0 %v860_v44  ;;  %v891_v43 = vunpack.c.h.s8.bf16 %v675_v35  ;;  %v894_v44 = vunpack.c.l.s8.bf16 %v678_v40  ;;  %v896_v45 = vunpack.c.l.s8.bf16 %v680_v41  ;;  %v900_v53 = vunpack.c.h.s8.bf16 %v680_v41 }
 0x1ed   :  { %v922_v40 = vunpack.c.h.s8.bf16 %v690_v25  ;;  %v707_v25 = vld [vmem:[#allocation7 + $0x3b0] sm:$0xff] }
 0x1ef   :  { %1062 = vmatpush1.bf16.msra.mxu1 %v857_v48  ;;  %1226 = vmatpush1.bf16.msra.mxu0 %v859_v49  ;;  %v679_v48 = vld [vmem:[#allocation7 + $0x2d0] sm:$0xff]  ;;  %v228_v49 = vsub.s32 4, %v2933_v60 }
 0x1f0   :  { %1063 = vmatprep.subr.bf16.mxu1 %v862_v50  ;;  %1227 = vmatprep.subr.bf16.mxu0 %v864_v51  ;;  %v893_v50 = vunpack.c.l.s8.bf16 %v677_v46  ;;  %v895_v51 = vunpack.c.l.s8.bf16 %v679_v48  ;;  %v899_v2 = vunpack.c.h.s8.bf16 %v679_v48 }
 0x1f3   :  { %1064 = vmatpush1.bf16.msra.mxu1 %v861_v54  ;;  %1228 = vmatpush1.bf16.msra.mxu0 %v863_v56  ;;  %v682_v54 = vld [vmem:[#allocation7 + $0x2e8] sm:$0xff]  ;;  %v684_v56 = vld [vmem:[#allocation7 + $0x2f8] sm:$0xff] }
 0x1f4   :  { %1065 = vmatprep.subr.bf16.mxu1 %v866_v57  ;;  %1229 = vmatprep.subr.bf16.mxu0 %v868_v58  ;;  %v240_v57 = vsub.s32 7, %v2933_v60  ;;  %v229_v58 = vrot.slane %v2938_v62, %v228_v49  ;;  %v693_v49 = vld [vmem:[#allocation7 + $0x340] sm:$0xff] }
 0x1f6   :  { %v241_v7 = vrot.slane %v2938_v62, %v240_v57  ;;  %v481_v8 = vadd.f32 %v2954_v28, %v229_v58  ;;  %v910_v62 = vunpack.c.l.s8.bf16 %v686_v14  ;;  %v912_v28 = vunpack.c.l.s8.bf16 %v688_v15  ;;  %v700_v57 = vld [vmem:[#allocation7 + $0x378] sm:$0xff] }
 0x1f7   :  { %1066 = vmatpush1.bf16.msra.mxu1 %v865_v3  ;;  %1230 = vmatpush1.bf16.msra.mxu0 %v867_v4  ;;  %v902_v3 = vunpack.c.l.s8.bf16 %v682_v54  ;;  %v904_v4 = vunpack.c.l.s8.bf16 %v684_v56  ;;  %v929_v58 = vunpack.c.h.s8.bf16 %v693_v49 }
 0x1f8   :  { %1067 = vmatprep.subr.bf16.mxu1 %v870_v5  ;;  %1231 = vmatprep.subr.bf16.mxu0 %v872_v6  ;;  %v681_v5 = vld [vmem:[#allocation7 + $0x2e0] sm:$0xff]  ;;  %v683_v6 = vld [vmem:[#allocation7 + $0x2f0] sm:$0xff] }
 0x1fb   :  { %1068 = vmatpush1.bf16.msra.mxu1 %v869_v9  ;;  %1232 = vmatpush1.bf16.msra.mxu0 %v871_v10  ;;  %v901_v9 = vunpack.c.l.s8.bf16 %v681_v5  ;;  %v903_v10 = vunpack.c.l.s8.bf16 %v683_v6 }
 0x1fc   :  { %1069 = vmatprep.subr.bf16.mxu1 %v874_v11  ;;  %1233 = vmatprep.subr.bf16.mxu0 %v876_v12  ;;  %v906_v11 = vunpack.c.h.s8.bf16 %v682_v54  ;;  %v908_v12 = vunpack.c.h.s8.bf16 %v684_v56  ;;  %v698_v56 = vld [vmem:[#allocation7 + $0x368] sm:$0xff] }
 0x1ff   :  { %1070 = vmatpush1.bf16.msra.mxu1 %v873_v16  ;;  %1234 = vmatpush1.bf16.msra.mxu0 %v875_v17  ;;  %v524_v16 = vadd.f32 %v2960_v0, %v241_v7  ;;  %v573_v17 = vmax.f32 %v481_v8, 0.0  ;;  %v914_v0 = vunpack.c.h.s8.bf16 %v686_v14  ;;  %v938_v8 = vunpack.c.h.s8.bf16 %v698_v56 }
 0x200   :  { %1071 = vmatprep.subr.bf16.mxu1 %v878_v13  ;;  %1235 = vmatprep.subr.bf16.mxu0 %v880_v18  ;;  %v905_v13 = vunpack.c.h.s8.bf16 %v681_v5  ;;  %v907_v18 = vunpack.c.h.s8.bf16 %v683_v6  ;;  %v699_v5 = vld [vmem:[#allocation7 + $0x370] sm:$0xff] }
 0x201   :  { %v935_v7 = vunpack.c.l.s8.bf16 %v699_v5  ;;  %v939_v14 = vunpack.c.h.s8.bf16 %v699_v5  ;;  %v1362_v5 = vld [vmem:[#allocation10 + $0x8] sm:$0xff] }
 0x203   :  { %1072 = vmatpush1.bf16.msra.mxu1 %v877_v21  ;;  %1236 = vmatpush1.bf16.msra.mxu0 %v879_v22  ;;  %v576_v21 = vmax.f32 %v524_v16, 0.0  ;;  %v583_v22 = vpack.c.bf16 %v573_v17, %v573_v17  ;;  %v701_v17 = vld [vmem:[#allocation7 + $0x380] sm:$0xff] }
 0x204   :  { %1073 = vmatprep.subr.bf16.mxu1 %v882_v23  ;;  %1237 = vmatprep.subr.bf16.mxu0 %v884_v24  ;;  %v909_v23 = vunpack.c.l.s8.bf16 %v685_v19  ;;  %v911_v24 = vunpack.c.l.s8.bf16 %v687_v20 }
 0x207   :  { %1074 = vmatpush1.bf16.msra.mxu1 %v881_v26  ;;  %1238 = vmatpush1.bf16.msra.mxu0 %v883_v27  ;;  %v692_v26 = vld [vmem:[#allocation7 + $0x338] sm:$0xff]  ;;  %v586_v27 = vpack.c.bf16 %v576_v21, %v576_v21 }
 0x208   :  { %1075 = vmatprep.subr.bf16.mxu1 %v886_v29  ;;  %1239 = vmatprep.subr.bf16.mxu0 %v888_v32  ;;  %v913_v29 = vunpack.c.h.s8.bf16 %v685_v19  ;;  %v915_v32 = vunpack.c.h.s8.bf16 %v687_v20  ;;  %v920_v35 = vunpack.c.l.s8.bf16 %v692_v26  ;;  %v924_v41 = vunpack.c.h.s8.bf16 %v692_v26  ;;  %v706_v20 = vld [vmem:[#allocation7 + $0x3a8] sm:$0xff]  ;;  %v708_v21 = vld [vmem:[#allocation7 + $0x3b8] sm:$0xff] }
 0x20b   :  { %1076 = vmatpush1.bf16.msra.mxu1 %v885_v36  ;;  %1240 = vmatpush1.bf16.msra.mxu0 %v887_v37  ;;  %v689_v36 = vld [vmem:[#allocation7 + $0x320] sm:$0xff]  ;;  %v691_v37 = vld [vmem:[#allocation7 + $0x330] sm:$0xff] }
 0x20c   :  { %1077 = vmatprep.subr.bf16.mxu1 %v890_v38  ;;  %1241 = vmatprep.subr.bf16.mxu0 %v892_v39  ;;  %v917_v38 = vunpack.c.l.s8.bf16 %v689_v36  ;;  %v919_v39 = vunpack.c.l.s8.bf16 %v691_v37 }
 0x20f   :  { %1078 = vmatpush1.bf16.msra.mxu1 %v889_v42  ;;  %1242 = vmatpush1.bf16.msra.mxu0 %v891_v43  ;;  %v694_v42 = vld [vmem:[#allocation7 + $0x348] sm:$0xff]  ;;  %v696_v43 = vld [vmem:[#allocation7 + $0x358] sm:$0xff] }
 0x210   :  { %1079 = vmatprep.subr.bf16.mxu1 %v894_v44  ;;  %1243 = vmatprep.subr.bf16.mxu0 %v896_v45  ;;  %v921_v44 = vunpack.c.h.s8.bf16 %v689_v36  ;;  %v923_v45 = vunpack.c.h.s8.bf16 %v691_v37  ;;  %v926_v46 = vunpack.c.l.s8.bf16 %v694_v42  ;;  %v928_v48 = vunpack.c.l.s8.bf16 %v696_v43 }
 0x211   :  { %v932_v54 = vunpack.c.h.s8.bf16 %v696_v43  ;;  %v955_v37 = vunpack.c.h.s8.bf16 %v707_v25 }
 0x213   :  { %1080 = vmatpush1.bf16.msra.mxu1 %v893_v50  ;;  %1244 = vmatpush1.bf16.msra.mxu0 %v895_v51  ;;  %v695_v50 = vld [vmem:[#allocation7 + $0x350] sm:$0xff]  ;;  %v925_v51 = vunpack.c.l.s8.bf16 %v693_v49  ;;  %v716_v49 = vld [vmem:[#allocation7 + $0x3f8] sm:$0xff] }
 0x214   :  { %1081 = vmatprep.subr.bf16.mxu1 %v898_v52  ;;  %1245 = vmatprep.subr.bf16.mxu0 %v900_v53  ;;  %v927_v52 = vunpack.c.l.s8.bf16 %v695_v50  ;;  %v930_v53 = vunpack.c.h.s8.bf16 %v694_v42 }
 0x217   :  { %1082 = vmatpush1.bf16.msra.mxu1 %v897_v59  ;;  %1246 = vmatpush1.bf16.msra.mxu0 %v899_v2  ;;  %v931_v59 = vunpack.c.h.s8.bf16 %v695_v50  ;;  %v934_v2 = vunpack.c.l.s8.bf16 %v698_v56  ;;  %v968_v56 = vunpack.c.l.s8.bf16 %v716_v49 }
 0x218   :  { %1083 = vmatprep.subr.bf16.mxu1 %v902_v3  ;;  %1247 = vmatprep.subr.bf16.mxu0 %v904_v4  ;;  %v936_v3 = vunpack.c.l.s8.bf16 %v700_v57  ;;  %v697_v4 = vld [vmem:[#allocation7 + $0x360] sm:$0xff] }
 0x219   :  { %v933_v6 = vunpack.c.l.s8.bf16 %v697_v4 }
 0x21b   :  { %1084 = vmatpush1.bf16.msra.mxu1 %v901_v9  ;;  %1248 = vmatpush1.bf16.msra.mxu0 %v903_v10  ;;  %v940_v9 = vunpack.c.h.s8.bf16 %v700_v57  ;;  %v702_v10 = vld [vmem:[#allocation7 + $0x388] sm:$0xff]  ;;  %v713_v57 = vld [vmem:[#allocation7 + $0x3e0] sm:$0xff] }
 0x21c   :  { %1085 = vmatprep.subr.bf16.mxu1 %v906_v11  ;;  %1249 = vmatprep.subr.bf16.mxu0 %v908_v12  ;;  %v704_v11 = vld [vmem:[#allocation7 + $0x398] sm:$0xff]  ;;  %v937_v12 = vunpack.c.h.s8.bf16 %v697_v4  ;;  %v942_v15 = vunpack.c.l.s8.bf16 %v702_v10  ;;  %v972_v4 = vunpack.c.h.s8.bf16 %v716_v49 }
 0x21d   :  { %v944_v16 = vunpack.c.l.s8.bf16 %v704_v11  ;;  %v948_v19 = vunpack.c.h.s8.bf16 %v704_v11 }
 0x21f   :  { %1086 = vmatpush1.bf16.msra.mxu1 %v905_v13  ;;  %1250 = vmatpush1.bf16.msra.mxu0 %v907_v18  ;;  %v703_v13 = vld [vmem:[#allocation7 + $0x390] sm:$0xff]  ;;  %v941_v18 = vunpack.c.l.s8.bf16 %v701_v17 }
 0x220   :  { %1096 = vmatprep.subr.bf16.mxu1 %v910_v62  ;;  %1260 = vmatprep.subr.bf16.mxu0 %v912_v28  ;;  %v943_v62 = vunpack.c.l.s8.bf16 %v703_v13  ;;  %v946_v28 = vunpack.c.h.s8.bf16 %v702_v10  ;;  %v1361_v10 = vld [vmem:[#allocation10] sm:$0xff] }
 0x221   :  { %v1393_v11 = vunpack.c.l.s8.bf16 %v1361_v10 }
 0x222   :  { %1088 = vmatmul.mubr.bf16.vlgmr.msra.gmra.mrb[8].mxu1 %v583_v22  ;;  %1252 = vmatmul.mubr.bf16.vlgmr.msra.gmra.mrb[12].mxu0 %v583_v22  ;;  %v945_v22 = vunpack.c.h.s8.bf16 %v701_v17  ;;  %v1363_v17 = vld [vmem:[#allocation10 + $0x10] sm:$0xff] }
 0x223   :  { %1097 = vmatpush1.bf16.msra.mxu1 %v909_v23  ;;  %1261 = vmatpush1.bf16.msra.mxu0 %v911_v24  ;;  %v947_v23 = vunpack.c.h.s8.bf16 %v703_v13  ;;  %v950_v24 = vunpack.c.l.s8.bf16 %v706_v20  ;;  %v1397_v13 = vunpack.c.l.s8.bf16 %v1363_v17 }
 0x224   :  { %1098 = vmatprep.subr.bf16.mxu1 %v914_v0  ;;  %1262 = vmatprep.subr.bf16.mxu0 %v916_v30  ;;  %v952_v0 = vunpack.c.l.s8.bf16 %v708_v21  ;;  %v705_v30 = vld [vmem:[#allocation7 + $0x3a0] sm:$0xff] }
 0x225   :  { %1128 = vmatprep.mubr.bf16.mxu1 %v586_v27  ;;  %1292 = vmatprep.mubr.bf16.mxu0 %v586_v27  ;;  %v949_v26 = vunpack.c.l.s8.bf16 %v705_v30  ;;  %v951_v27 = vunpack.c.l.s8.bf16 %v707_v25  ;;  %v953_v36 = vunpack.c.h.s8.bf16 %v705_v30  ;;  %v1367_v30 = vld [vmem:[#allocation10 + $0x30] sm:$0xff] }
 0x226   :  { %v1405_v25 = vunpack.c.l.s8.bf16 %v1367_v30 }
 0x227   :  { %1099 = vmatpush1.bf16.msra.mxu1 %v913_v29  ;;  %1263 = vmatpush1.bf16.msra.mxu0 %v915_v32  ;;  %v954_v29 = vunpack.c.h.s8.bf16 %v706_v20  ;;  %v956_v32 = vunpack.c.h.s8.bf16 %v708_v21  ;;  %v1365_v20 = vld [vmem:[#allocation10 + $0x20] sm:$0xff] }
 0x228   :  { %1100 = vmatprep.subr.bf16.mxu1 %v918_v33  ;;  %1264 = vmatprep.subr.bf16.mxu0 %v920_v35  ;;  %v710_v33 = vld [vmem:[#allocation7 + $0x3c8] sm:$0xff]  ;;  %v712_v35 = vld [vmem:[#allocation7 + $0x3d8] sm:$0xff]  ;;  %v1401_v21 = vunpack.c.l.s8.bf16 %v1365_v20 }
 0x22b   :  { %1101 = vmatpush1.bf16.msra.mxu1 %v917_v38  ;;  %1265 = vmatpush1.bf16.msra.mxu0 %v919_v39  ;;  %v958_v38 = vunpack.c.l.s8.bf16 %v710_v33  ;;  %v960_v39 = vunpack.c.l.s8.bf16 %v712_v35 }
 0x22c   :  { %1102 = vmatprep.subr.bf16.mxu1 %v922_v40  ;;  %1266 = vmatprep.subr.bf16.mxu0 %v924_v41  ;;  %v709_v40 = vld [vmem:[#allocation7 + $0x3c0] sm:$0xff]  ;;  %v711_v41 = vld [vmem:[#allocation7 + $0x3d0] sm:$0xff] }
 0x22d   :  { %v957_v42 = vunpack.c.l.s8.bf16 %v709_v40  ;;  %v959_v43 = vunpack.c.l.s8.bf16 %v711_v41  ;;  %v961_v50 = vunpack.c.h.s8.bf16 %v709_v40  ;;  %v1371_v40 = vld [vmem:[#allocation10 + $0x50] sm:$0xff] }
 0x22f   :  { %1103 = vmatpush1.bf16.msra.mxu1 %v921_v44  ;;  %1267 = vmatpush1.bf16.msra.mxu0 %v923_v45  ;;  %v236_v44 = vsub.s32 6, %v2933_v60  ;;  %v962_v45 = vunpack.c.h.s8.bf16 %v710_v33  ;;  %v965_v60 = vunpack.c.l.s8.bf16 %v713_v57  ;;  %v1369_v33 = vld [vmem:[#allocation10 + $0x40] sm:$0xff] }
 0x230   :  { %1104 = vmatprep.subr.bf16.mxu1 %v926_v46  ;;  %1268 = vmatprep.subr.bf16.mxu0 %v928_v48  ;;  %v964_v46 = vunpack.c.h.s8.bf16 %v712_v35  ;;  %v714_v48 = vld [vmem:[#allocation7 + $0x3e8] sm:$0xff]  ;;  %v1409_v35 = vunpack.c.l.s8.bf16 %v1369_v33 }
 0x233   :  { %1105 = vmatpush1.bf16.msra.mxu1 %v925_v51  ;;  %1269 = vmatpush1.bf16.msra.mxu0 %v927_v52  ;;  %v963_v51 = vunpack.c.h.s8.bf16 %v711_v41  ;;  %v2457_v52 = vld [vmem:[#allocation6] sm:$0xff]  ;;  %v1413_v41 = vunpack.c.l.s8.bf16 %v1371_v40 }
 0x234   :  { %1106 = vmatprep.subr.bf16.mxu1 %v930_v53  ;;  %1270 = vmatprep.subr.bf16.mxu0 %v932_v54  ;;  %v237_v53 = vrot.slane %v2457_v52, %v236_v44  ;;  %v966_v54 = vunpack.c.l.s8.bf16 %v714_v48  ;;  %v1415_v44 = vunpack.c.h.s8.bf16 %v1371_v40 }
 0x237   :  { %1107 = vmatpush1.bf16.msra.mxu1 %v929_v58  ;;  %1271 = vmatpush1.bf16.msra.mxu0 %v931_v59  ;;  %v715_v58 = vld [vmem:[#allocation7 + $0x3f0] sm:$0xff] }
 0x238   :  { %1108 = vmatprep.subr.bf16.mxu1 %v934_v2  ;;  %1272 = vmatprep.subr.bf16.mxu0 %v936_v3  ;;  %v967_v59 = vunpack.c.l.s8.bf16 %v715_v58  ;;  %v522_v2 = vadd.f32 %v2958_v55, %v237_v53  ;;  %v970_v3 = vunpack.c.h.s8.bf16 %v714_v48  ;;  %v1396_v55 = vunpack.c.h.s8.bf16 %v1362_v5  ;;  %v1375_v53 = vld [vmem:[#allocation10 + $0x70] sm:$0xff] }
 0x23b   :  { %1109 = vmatpush1.bf16.msra.mxu1 %v933_v6  ;;  %1273 = vmatpush1.bf16.msra.mxu0 %v935_v7  ;;  %v969_v6 = vunpack.c.h.s8.bf16 %v713_v57  ;;  %v971_v7 = vunpack.c.h.s8.bf16 %v715_v58  ;;  %v1423_v57 = vunpack.c.h.s8.bf16 %v1375_v53  ;;  %v2983_v58 = vld [vmem:[#allocation10 + $0x88] sm:$0xff] }
 0x23c   :  { %1110 = vmatprep.subr.bf16.mxu1 %v938_v8  ;;  %1274 = vmatprep.subr.bf16.mxu0 %v940_v9  ;;  %v575_v8 = vmax.f32 %v522_v2, 0.0  ;;  %v1394_v9 = vunpack.c.l.s8.bf16 %v1362_v5  ;;  %v2410_v2 = vld [vmem:[#allocation12] sm:$0xff]   ;;  %v2413_v5 = vld [vmem:[#allocation12 + $0x50] sm:$0xff]  }
 0x23f   :  { %1111 = vmatpush1.bf16.msra.mxu1 %v937_v12  ;;  %1275 = vmatpush1.bf16.msra.mxu0 %v939_v14  ;;  %v585_v12 = vpack.c.bf16 %v575_v8, %v575_v8  ;;  %v1364_v14 = vld [vmem:[#allocation10 + $0x18] sm:$0xff] }
 0x240   :  { %1112 = vmatprep.subr.bf16.mxu1 %v942_v15  ;;  %1276 = vmatprep.subr.bf16.mxu0 %v944_v16  ;;  %v1395_v15 = vunpack.c.h.s8.bf16 %v1361_v10  ;;  %v1398_v16 = vunpack.c.l.s8.bf16 %v1364_v14  ;;  %v2416_v8 = vld [vmem:[#allocation12 + $0x18] sm:$0xff]   ;;  %v2418_v10 = vld [vmem:[#allocation12 + $0x20] sm:$0xff]  }
 0x243   :  { %1113 = vmatpush1.bf16.msra.mxu1 %v941_v18  ;;  %1277 = vmatpush1.bf16.msra.mxu0 %v943_v62  ;;  %v1400_v18 = vunpack.c.h.s8.bf16 %v1364_v14  ;;  %v1366_v62 = vld [vmem:[#allocation10 + $0x28] sm:$0xff]  ;;  %v1327_v14 = vld [vmem:[#allocation9] sm:$0xf] }
 0x244   :  { %1114 = vmatprep.subr.bf16.mxu1 %v946_v28  ;;  %1278 = vmatprep.subr.bf16.mxu0 %v948_v19  ;;  %v1399_v28 = vunpack.c.h.s8.bf16 %v1363_v17  ;;  %v1402_v19 = vunpack.c.l.s8.bf16 %v1366_v62 }
 0x247   :  { %1115 = vmatpush1.bf16.msra.mxu1 %v945_v22  ;;  %1279 = vmatpush1.bf16.msra.mxu0 %v947_v23  ;;  %v1404_v22 = vunpack.c.h.s8.bf16 %v1366_v62  ;;  %v1368_v23 = vld [vmem:[#allocation10 + $0x38] sm:$0xff]  ;;  %v1340_v62 = vrot.slane %v1327_v14, %v2963_v47 }
 0x248   :  { %1116 = vmatprep.subr.bf16.mxu1 %v950_v24  ;;  %1280 = vmatprep.subr.bf16.mxu0 %v952_v0  ;;  %v1403_v24 = vunpack.c.h.s8.bf16 %v1365_v20  ;;  %v1406_v0 = vunpack.c.l.s8.bf16 %v1368_v23  ;;  %v1336_v20 = vrot.slane %v1327_v14, %v2941_v63 }
 0x24b   :  { %1117 = vmatpush1.bf16.msra.mxu1 %v949_v26  ;;  %1281 = vmatpush1.bf16.msra.mxu0 %v951_v27  ;;  %v1408_v26 = vunpack.c.h.s8.bf16 %v1368_v23  ;;  %v1370_v27 = vld [vmem:[#allocation10 + $0x48] sm:$0xff] }
 0x24c   :  { %1118 = vmatprep.subr.bf16.mxu1 %v954_v29  ;;  %1282 = vmatprep.subr.bf16.mxu0 %v956_v32  ;;  %v1407_v29 = vunpack.c.h.s8.bf16 %v1367_v30  ;;  %v1410_v32 = vunpack.c.l.s8.bf16 %v1370_v27 }
 0x24f   :  { %1119 = vmatpush1.bf16.msra.mxu1 %v953_v36  ;;  %1283 = vmatpush1.bf16.msra.mxu0 %v955_v37  ;;  %v1412_v36 = vunpack.c.h.s8.bf16 %v1370_v27  ;;  %v1372_v37 = vld [vmem:[#allocation10 + $0x58] sm:$0xff] }
 0x250   :  { %1120 = vmatprep.subr.bf16.mxu1 %v958_v38  ;;  %1284 = vmatprep.subr.bf16.mxu0 %v960_v39  ;;  %v1411_v38 = vunpack.c.h.s8.bf16 %v1369_v33  ;;  %v1414_v39 = vunpack.c.l.s8.bf16 %v1372_v37 }
 0x253   :  { %1121 = vmatpush1.bf16.msra.mxu1 %v957_v42  ;;  %1285 = vmatpush1.bf16.msra.mxu0 %v959_v43  ;;  %v1416_v42 = vunpack.c.h.s8.bf16 %v1372_v37  ;;  %v1374_v43 = vld [vmem:[#allocation10 + $0x68] sm:$0xff] }
 0x254   :  { %1122 = vmatprep.subr.bf16.mxu1 %v962_v45  ;;  %1286 = vmatprep.subr.bf16.mxu0 %v964_v46  ;;  %v1418_v45 = vunpack.c.l.s8.bf16 %v1374_v43  ;;  %v1373_v46 = vld [vmem:[#allocation10 + $0x60] sm:$0xff]  ;;  %v1420_v49 = vunpack.c.h.s8.bf16 %v1374_v43  ;;  %v1428_v43 = vunpack.c.h.s8.bf16 %v2983_v58 }
 0x255   :  { %v1417_v48 = vunpack.c.l.s8.bf16 %v1373_v46 }
 0x257   :  { %1123 = vmatpush1.bf16.msra.mxu1 %v961_v50  ;;  %1287 = vmatpush1.bf16.msra.mxu0 %v963_v51  ;;  %v1419_v50 = vunpack.c.h.s8.bf16 %v1373_v46  ;;  %v1376_v51 = vld [vmem:[#allocation10 + $0x78] sm:$0xff] }
 0x258   :  { %1124 = vmatprep.subr.bf16.mxu1 %v966_v54  ;;  %1288 = vmatprep.subr.bf16.mxu0 %v968_v56  ;;  %v1422_v52 = vunpack.c.l.s8.bf16 %v1376_v51  ;;  %v1421_v54 = vunpack.c.l.s8.bf16 %v1375_v53  ;;  %v1424_v56 = vunpack.c.h.s8.bf16 %v1376_v51 }
 0x25b   :  { %1125 = vmatpush1.bf16.msra.mxu1 %v965_v60  ;;  %1289 = vmatpush1.bf16.msra.mxu0 %v967_v59  ;;  %v1426_v60 = vunpack.c.l.s8.bf16 %v2983_v58  ;;  %v2409_v59 = vld [vmem:[#allocation12 + $0x40] sm:$0xff]  }
 0x25c   :  { %1126 = vmatprep.subr.bf16.mxu1 %v970_v3  ;;  %1290 = vmatprep.subr.bf16.mxu0 %v972_v4  ;;  %v2411_v3 = vld [vmem:[#allocation12 + $0x48] sm:$0xff]  }
 0x25d   :  { %v2412_v4 = vld [vmem:[#allocation12 + $0x8] sm:$0xff]  }
 0x25f   :  { %1127 = vmatpush1.bf16.msra.mxu1 %v969_v6  ;;  %1291 = vmatpush1.bf16.msra.mxu0 %v971_v7  ;;  %v2414_v6 = vld [vmem:[#allocation12 + $0x10] sm:$0xff]   ;;  %v2415_v7 = vld [vmem:[#allocation12 + $0x58] sm:$0xff]  }
 0x260   :  { %1457 = vmatprep.subr.bf16.mxu1 %v1394_v9  ;;  %2228 = vmatprep.subr.bf16.mxu0 %v2409_v59  ;;  %v2417_v9 = vld [vmem:[#allocation12 + $0x60] sm:$0xff]  }
 0x262   :  { %1129 = vmatmul.mubr.bf16.vlgmr.msra.gmra.mrb[8].mxu1 %v585_v12  ;;  %1293 = vmatmul.mubr.bf16.vlgmr.msra.gmra.mrb[12].mxu0 %v585_v12  ;;  %v2420_v12 = vld [vmem:[#allocation12 + $0x28] sm:$0xff]  }
 0x263   :  { %1458 = vmatpush1.bf16.msra.mxu1 %v1393_v11  ;;  %2229 = vmatpush3.bf16.msra.mxu0 %v2410_v2  ;;  %v2419_v11 = vld [vmem:[#allocation12 + $0x68] sm:$0xff]  }
 0x264   :  { %1459 = vmatprep.subr.bf16.mxu1 %v1396_v55  ;;  %2230 = vmatprep.subr.bf16.mxu0 %v2411_v3  ;;  %v1301_v55 = vld [vmem:[%s3051_s4] sm:$0xf]  ;;  %v1383_v3 = vld [vmem:[#allocation10 + $0xb0] sm:$0xff] }
 0x265   :  { %v1310_v17 = vrot.slane %v1301_v55, %v2941_v63 }
 0x267   :  { %1460 = vmatpush1.bf16.msra.mxu1 %v1395_v15  ;;  %2231 = vmatpush3.bf16.msra.mxu0 %v2412_v4  ;;  %v1306_v15 = vrot.slane %v1301_v55, %v2936_v61  ;;  %v1437_v4 = vunpack.c.l.s8.bf16 %v1383_v3 }
 0x268   :  { %1461 = vmatprep.subr.bf16.mxu1 %v1398_v16  ;;  %2232 = vmatprep.subr.bf16.mxu0 %v2413_v5  ;;  %v1314_v16 = vrot.slane %v1301_v55, %v2963_v47 }
 0x26b   :  { %1462 = vmatpush1.bf16.msra.mxu1 %v1397_v13  ;;  %2233 = vmatpush3.bf16.msra.mxu0 %v2414_v6  ;;  %v1318_v13 = vrot.slane %v1301_v55, %v2946_v1  ;;  %v1386_v6 = vld [vmem:[#allocation10 + $0xc8] sm:$0xff] }
 0x26c   :  { %1463 = vmatprep.subr.bf16.mxu1 %v1400_v18  ;;  %2234 = vmatprep.subr.bf16.mxu0 %v2415_v7  ;;  %v1332_v18 = vrot.slane %v1327_v14, %v2936_v61  ;;  %v1439_v7 = vunpack.c.h.s8.bf16 %v1383_v3  ;;  %v2430_v3 = vld [vmem:[#allocation15 + $0x10] sm:$0xff]  }
 0x26f   :  { %1464 = vmatpush1.bf16.msra.mxu1 %v1399_v28  ;;  %2235 = vmatpush3.bf16.msra.mxu0 %v2416_v8  ;;  %v1442_v8 = vunpack.c.l.s8.bf16 %v1386_v6 }
 0x270   :  { %1465 = vmatprep.subr.bf16.mxu1 %v1402_v19  ;;  %2236 = vmatprep.subr.bf16.mxu0 %v2417_v9  ;;  %v1385_v9 = vld [vmem:[#allocation10 + $0xc0] sm:$0xff] }
 0x271   :  { %v1443_v55 = vunpack.c.h.s8.bf16 %v1385_v9 }
 0x273   :  { %1466 = vmatpush1.bf16.msra.mxu1 %v1401_v21  ;;  %2237 = vmatpush3.bf16.msra.mxu0 %v2418_v10  ;;  %v1344_v21 = vrot.slane %v1327_v14, %v2946_v1  ;;  %v1441_v10 = vunpack.c.l.s8.bf16 %v1385_v9  ;;  %v2436_v9 = vld [vmem:[#allocation15 + $0x28] sm:$0xff]  }
 0x274   :  { %1467 = vmatprep.subr.bf16.mxu1 %v1404_v22  ;;  %2238 = vmatprep.subr.bf16.mxu0 %v2419_v11  ;;  %v1444_v11 = vunpack.c.h.s8.bf16 %v1386_v6  ;;  %v2433_v6 = vld [vmem:[#allocation15 + $0x60] sm:$0xff]  }
 0x277   :  { %1468 = vmatpush1.bf16.msra.mxu1 %v1403_v24  ;;  %2239 = vmatpush3.bf16.msra.mxu0 %v2420_v12  ;;  %v1388_v12 = vld [vmem:[#allocation10 + $0xd8] sm:$0xff] }
 0x278   :  { %1469 = vmatprep.subr.bf16.mxu1 %v1406_v0  ;;  %v1446_v14 = vunpack.c.l.s8.bf16 %v1388_v12 }
 0x27b   :  { %1470 = vmatpush1.bf16.msra.mxu1 %v1405_v25 }
 0x27c   :  { %1471 = vmatprep.subr.bf16.mxu1 %v1408_v26 }
 0x27f   :  { %1472 = vmatpush1.bf16.msra.mxu1 %v1407_v29 }
 0x280   :  { %1473 = vmatprep.subr.bf16.mxu1 %v1410_v32 }
 0x283   :  { %1474 = vmatpush1.bf16.msra.mxu1 %v1409_v35 }
 0x284   :  { %1475 = vmatprep.subr.bf16.mxu1 %v1412_v36 }
 0x287   :  { %1476 = vmatpush1.bf16.msra.mxu1 %v1411_v38  ;;  %v1377_v38 = vld [vmem:[#allocation10 + $0x80] sm:$0xff] }
 0x288   :  { %1477 = vmatprep.subr.bf16.mxu1 %v1414_v39  ;;  %v1427_v46 = vunpack.c.h.s8.bf16 %v1377_v38 }
 0x28b   :  { %1478 = vmatpush1.bf16.msra.mxu1 %v1413_v41  ;;  %v1425_v41 = vunpack.c.l.s8.bf16 %v1377_v38  ;;  %v207_v38 = vld [vmem:[#allocation6 + $0x8] sm:$0x3] }
 0x28c   :  { %1479 = vmatprep.subr.bf16.mxu1 %v1416_v42 }
 0x28f   :  { %1480 = vmatpush1.bf16.msra.mxu1 %v1415_v44 }
 0x290   :  { %1481 = vmatprep.subr.bf16.mxu1 %v1418_v45  ;;  %v1380_v45 = vld [vmem:[#allocation10 + $0x98] sm:$0xff] }
 0x291   :  { %v1432_v51 = vunpack.c.h.s8.bf16 %v1380_v45 }
 0x293   :  { %1482 = vmatpush1.bf16.msra.mxu1 %v1417_v48  ;;  %v1430_v48 = vunpack.c.l.s8.bf16 %v1380_v45 }
 0x294   :  { %1483 = vmatprep.subr.bf16.mxu1 %v1420_v49  ;;  %v1379_v49 = vld [vmem:[#allocation10 + $0x90] sm:$0xff] }
 0x295   :  { %v1431_v53 = vunpack.c.h.s8.bf16 %v1379_v49 }
 0x297   :  { %1484 = vmatpush1.bf16.msra.mxu1 %v1419_v50  ;;  %v1429_v50 = vunpack.c.l.s8.bf16 %v1379_v49 }
 0x298   :  { %1485 = vmatprep.subr.bf16.mxu1 %v1422_v52  ;;  %v1382_v52 = vld [vmem:[#allocation10 + $0xa8] sm:$0xff] }
 0x299   :  { %v1436_v58 = vunpack.c.h.s8.bf16 %v1382_v52 }
 0x29b   :  { %1486 = vmatpush1.bf16.msra.mxu1 %v1421_v54  ;;  %v1434_v54 = vunpack.c.l.s8.bf16 %v1382_v52 }
 0x29c   :  { %1487 = vmatprep.subr.bf16.mxu1 %v1424_v56  ;;  %v1381_v56 = vld [vmem:[#allocation10 + $0xa0] sm:$0xff] }
 0x29d   :  { %v1435_v59 = vunpack.c.h.s8.bf16 %v1381_v56 }
 0x29f   :  { %1488 = vmatpush1.bf16.msra.mxu1 %v1423_v57  ;;  %v1433_v57 = vunpack.c.l.s8.bf16 %v1381_v56 }
 0x2a0   :  { %1498 = vmatprep.subr.bf16.mxu1 %v1426_v60  ;;  %v1384_v60 = vld [vmem:[#allocation10 + $0xb8] sm:$0xff] }
 0x2a1   :  { %v1438_v2 = vunpack.c.l.s8.bf16 %v1384_v60  ;;  %v1440_v5 = vunpack.c.h.s8.bf16 %v1384_v60 }
 0x335   :  { %v1130_v28 = vpop.f32.mrb[8].mxu1  ;;  %v1294_v19 = vpop.f32.mrb[12].mxu0 }
 0x336   :  { %v1323_v22 = vmul.f32 %v1306_v15, %v1130_v28  ;;  %v1325_v23 = vmul.f32 %v1314_v16, %v1294_v19  ;;  %v1132_v24 = vpop.f32.mrb[9].mxu1  ;;  %v1296_v0 = vpop.f32.mrb[13].mxu0  ;;  %v1387_v15 = vld [vmem:[#allocation10 + $0xd0] sm:$0xff]  ;;  %v1389_v28 = vld [vmem:[#allocation10 + $0xe0] sm:$0xff] }
 0x337   :  { %v1324_v30 = vmul.f32 %v1310_v17, %v1132_v24  ;;  %v1326_v25 = vmul.f32 %v1318_v13, %v1296_v0  ;;  %v1134_v26 = vpop.f32.mrb[10].mxu1  ;;  %v1298_v27 = vpop.f32.mrb[14].mxu0  ;;  %v1445_v16 = vunpack.c.l.s8.bf16 %v1387_v15  ;;  %v1448_v17 = vunpack.c.h.s8.bf16 %v1388_v12  ;;  %v1390_v13 = vld [vmem:[#allocation10 + $0xe8] sm:$0xff]  ;;  %v1391_v24 = vld [vmem:[#allocation10 + $0xf0] sm:$0xff] }
 0x338   :  { %v1349_v29 = vadd.f32 %v1332_v18, %v1323_v22  ;;  %v2997_v32 = vadd.f32 %v1340_v62, %v1325_v23  ;;  %v1135_v33 = vpop.f32.mrb[11].mxu1  ;;  %v1299_v35 = vpop.f32.mrb[15].mxu0  ;;  %v1447_v18 = vunpack.c.h.s8.bf16 %v1387_v15  ;;  %v1450_v62 = vunpack.c.l.s8.bf16 %v1390_v13  ;;  %v2438_v12 = vld [vmem:[#allocation15 + $0x30] sm:$0xff]   ;;  %v2440_v15 = vld [vmem:[#allocation15 + $0x38] sm:$0xff]  }
 0x339   :  { %v1350_v47 = vadd.f32 %v1336_v20, %v1324_v30  ;;  %v1352_v36 = vadd.f32 %v1344_v21, %v1326_v25  ;;  %v1449_v19 = vunpack.c.l.s8.bf16 %v1389_v28  ;;  %v1452_v20 = vunpack.c.h.s8.bf16 %v1390_v13  ;;  %v1392_v21 = vld [vmem:[#allocation10 + $0xf8] sm:$0xff]  ;;  %v2422_v33 = vld [vmem:[#allocation12 + $0x30] sm:$0xff]  }
 0x33a   :  { %v1353_v37 = vmax.f32 %v1349_v29, 0.0  ;;  %v1451_v22 = vunpack.c.h.s8.bf16 %v1389_v28  ;;  %v1454_v23 = vunpack.c.l.s8.bf16 %v1392_v21  ;;  %v1453_v0 = vunpack.c.l.s8.bf16 %v1391_v24  ;;  %v2421_v29 = vld [vmem:[#allocation12 + $0x70] sm:$0xff]   ;;  %v2423_v35 = vld [vmem:[#allocation12 + $0x78] sm:$0xff]   ;;  %v2445_v28 = vld [vmem:[#allocation13 + $0x20] sm:$0xff]  }
 0x33b   :  { %v1354_v39 = vmax.f32 %v1350_v47, 0.0  ;;  %v1356_v40 = vmax.f32 %v1352_v36, 0.0  ;;  %v1456_v30 = vunpack.c.h.s8.bf16 %v1392_v21  ;;  %v1455_v25 = vunpack.c.h.s8.bf16 %v1391_v24  ;;  %2240 = vmatprep.subr.bf16.mxu0 %v2421_v29  ;;  %v2424_v47 = vld [vmem:[#allocation12 + $0x38] sm:$0xff]   ;;  %v2425_v36 = vld [vmem:[#allocation15 + $0x40] sm:$0xff]  }
 0x33c   :  { %v1357_v42 = vpack.c.bf16 %v1353_v37, %v1353_v37  ;;  %v1355_v26 = vmax.f32 %v2997_v32, 0.0  ;;  %2241 = vmatpush3.bf16.msra.mxu0 %v2422_v33  ;;  %v1539_v37 = vld [vmem:[%s3054_s7] sm:$0x3]  ;;  %v2448_v21 = vld [vmem:[#allocation13 + $0x38] sm:$0xff]   ;;  %v2449_v29 = vld [vmem:[#allocation16] sm:$0xff]  }
 0x33d   :  { %v1358_v1 = vpack.c.bf16 %v1354_v39, %v1354_v39  ;;  %v1360_v44 = vpack.c.bf16 %v1356_v40, %v1356_v40  ;;  %2242 = vmatprep.subr.bf16.mxu0 %v2423_v35  ;;  %v1553_v32 = vld [vmem:[%s3055_s8] sm:$0x3]  ;;  %v1544_v39 = vrot.slane %v1539_v37, %v2936_v61  ;;  %v249_v40 = vrot.slane %v207_v38, %v2941_v63 }
 0x33e   :  { %v1359_v27 = vpack.c.bf16 %v1355_v26, %v1355_v26  ;;  %v2450_v35 = vld [vmem:[#allocation16 + $0x8] sm:$0xff]  }
 0x33f   :  { %1489 = vmatprep.mubr.bf16.mxu1 %v1358_v1  ;;  %v1548_v1 = vrot.slane %v1539_v37, %v2941_v63  ;;  %v2453_v37 = vld [vmem:[#allocation16 + $0x20] sm:$0xff]  }
 0x340   :  { %1490 = vmatmul.mubr.bf16.vlgmr.msra.gmra.mrb[12].mxu1 %v1357_v42  ;;  %2243 = vmatpush3.bf16.msra.mxu0 %v2424_v47  ;;  %v2451_v47 = vld [vmem:[#allocation16 + $0x10] sm:$0xff]  }
 0x341   :  { %1499 = vmatpush1.bf16.msra.mxu1 %v1425_v41  ;;  %1530 = vmatprep.mubr.bf16.mxu1 %v1360_v44  ;;  %v1558_v41 = vrot.slane %v1553_v32, %v2936_v61 }
 0x342   :  { %1500 = vmatprep.subr.bf16.mxu1 %v1428_v43  ;;  %2250 = vmatprep.subr.bf16.mxu0 %v2425_v36  ;;  %v1562_v43 = vrot.slane %v1553_v32, %v2941_v63  ;;  %v2428_v63 = vld [vmem:[#allocation15 + $0x8] sm:$0xff]   ;;  %v2452_v36 = vld [vmem:[#allocation16 + $0x18] sm:$0xff]  }
 0x345   :  { %1501 = vmatpush1.bf16.msra.mxu1 %v1427_v46  ;;  %v565_v46 = vadd.f32 %v2973_v34, %v249_v40  ;;  %v2429_v34 = vld [vmem:[#allocation15 + $0x50] sm:$0xff]  }
 0x346   :  { %1502 = vmatprep.subr.bf16.mxu1 %v1430_v48 }
 0x349   :  { %1503 = vmatpush1.bf16.msra.mxu1 %v1429_v50 }
 0x34a   :  { %1504 = vmatprep.subr.bf16.mxu1 %v1432_v51 }
 0x34d   :  { %1505 = vmatpush1.bf16.msra.mxu1 %v1431_v53 }
 0x34e   :  { %1506 = vmatprep.subr.bf16.mxu1 %v1434_v54  ;;  %v578_v54 = vmax.f32 %v565_v46, 0.0 }
 0x351   :  { %1507 = vmatpush1.bf16.msra.mxu1 %v1433_v57 }
 0x352   :  { %1508 = vmatprep.subr.bf16.mxu1 %v1436_v58  ;;  %v2426_v58 = vld [vmem:[#allocation15] sm:$0xff]  }
 0x355   :  { %1509 = vmatpush1.bf16.msra.mxu1 %v1435_v59  ;;  %v2427_v59 = vld [vmem:[#allocation15 + $0x48] sm:$0xff]  }
 0x356   :  { %1510 = vmatprep.subr.bf16.mxu1 %v1438_v2  ;;  %v588_v2 = vpack.c.bf16 %v578_v54, %v578_v54  ;;  %v2219_v54 = vld [vmem:[%s3062_s15] ss:$0 sm:$0xff] }
 0x359   :  { %1511 = vmatpush1.bf16.msra.mxu1 %v1437_v4  ;;  %v2431_v4 = vld [vmem:[#allocation15 + $0x58] sm:$0xff]  }
 0x35a   :  { %1512 = vmatprep.subr.bf16.mxu1 %v1440_v5  ;;  %v2432_v5 = vld [vmem:[#allocation15 + $0x18] sm:$0xff]  }
 0x35d   :  { %1513 = vmatpush1.bf16.msra.mxu1 %v1439_v7  ;;  %v2434_v7 = vld [vmem:[#allocation15 + $0x20] sm:$0xff]  }
 0x35e   :  { %1514 = vmatprep.subr.bf16.mxu1 %v1442_v8  ;;  %v2435_v8 = vld [vmem:[#allocation15 + $0x68] sm:$0xff]  }
 0x361   :  { %1515 = vmatpush1.bf16.msra.mxu1 %v1441_v10  ;;  %v245_v10 = vrot.slane %v207_v38, %v2936_v61  ;;  %v2442_v61 = vld [vmem:[#allocation13 + $0x8] sm:$0xff]  }
 0x362   :  { %1516 = vmatprep.subr.bf16.mxu1 %v1444_v11  ;;  %v2437_v11 = vld [vmem:[#allocation15 + $0x70] sm:$0xff]   ;;  %v2454_v38 = vld [vmem:[#allocation16 + $0x28] sm:$0xff]  }
 0x365   :  { %1517 = vmatpush1.bf16.msra.mxu1 %v1443_v55  ;;  %v563_v55 = vadd.f32 %v2971_v31, %v245_v10  ;;  %v2444_v31 = vld [vmem:[#allocation13 + $0x18] sm:$0xff]  }
 0x366   :  { %1518 = vmatprep.subr.bf16.mxu1 %v1446_v14  ;;  %v2439_v14 = vld [vmem:[#allocation15 + $0x78] sm:$0xff]  }
 0x369   :  { %1519 = vmatpush1.bf16.msra.mxu1 %v1445_v16  ;;  %v577_v16 = vmax.f32 %v563_v55, 0.0 }
 0x36a   :  { %1520 = vmatprep.subr.bf16.mxu1 %v1448_v17  ;;  %v2441_v17 = vld [vmem:[#allocation13] sm:$0xff]  }
 0x36b   :  { %v587_v13 = vpack.c.bf16 %v577_v16, %v577_v16 }
 0x36d   :  { %1521 = vmatpush1.bf16.msra.mxu1 %v1447_v18  ;;  %v2709_v18 = vmov 0.0  }
 0x36e   :  { %1522 = vmatprep.subr.bf16.mxu1 %v1450_v62  ;;  %v2443_v62 = vld [vmem:[#allocation13 + $0x10] sm:$0xff]  }
 0x371   :  { %1523 = vmatpush1.bf16.msra.mxu1 %v1449_v19  ;;  %v2446_v19 = vld [vmem:[#allocation13 + $0x28] sm:$0xff]  }
 0x372   :  { %1524 = vmatprep.subr.bf16.mxu1 %v1452_v20  ;;  %v2447_v20 = vld [vmem:[#allocation13 + $0x30] sm:$0xff]  }
 0x375   :  { %1525 = vmatpush1.bf16.msra.mxu1 %v1451_v22 }
 0x376   :  { %1526 = vmatprep.subr.bf16.mxu1 %v1454_v23  ;;  %v2177_v23 = vld [vmem:[%s3057_s10] ss:$0 sm:$0xff] }
 0x379   :  { %1527 = vmatpush1.bf16.msra.mxu1 %v1453_v0 }
 0x37a   :  { %1528 = vmatprep.subr.bf16.mxu1 %v1456_v30 }
 0x37d   :  { %1529 = vmatpush1.bf16.msra.mxu1 %v1455_v25 }
 0x380   :  { %1531 = vmatmul.mubr.bf16.vlgmr.msra.gmra.mrb[12].mxu1 %v1359_v27 }
 0x453   :  { %v1532_v42 = vpop.f32.mrb[12].mxu1 }
 0x454   :  { %v1551_v44 = vmul.f32 %v1544_v39, %v1532_v42  ;;  %v1534_v45 = vpop.f32.mrb[13].mxu1  ;;  %v2455_v42 = vld [vmem:[#allocation16 + $0x30] sm:$0xff]  }
 0x455   :  { %v1552_v48 = vmul.f32 %v1548_v1, %v1534_v45  ;;  %v1536_v49 = vpop.f32.mrb[14].mxu1  ;;  %v2218_v45 = vld [vmem:[%s3060_s13] ss:$0 sm:$0xff] }
 0x456   :  { %v1565_v50 = vadd.f32 %v1558_v41, %v1551_v44  ;;  %v1537_v51 = vpop.f32.mrb[15].mxu1 }
 0x457   :  { %v1566_v52 = vadd.f32 %v1562_v43, %v1552_v48  ;;  %v2456_v43 = vld [vmem:[#allocation16 + $0x38] sm:$0xff]  }
 0x458   :  { %v1567_v53 = vmax.f32 %v1565_v50, 0.0 }
 0x459   :  { %v1568_v56 = vmax.f32 %v1566_v52, 0.0 }
 0x45a   :  { %v1569_v60 = vpack.c.bf16 %v1567_v53, %v1567_v53 }
 0x45b   :  { %v1570_v57 = vpack.c.bf16 %v1568_v56, %v1568_v56 }
 0x45d   :  { %1738 = vmatprep.mubr.bf16.mxu0 %v1570_v57 }
 0x45e   :  { %1739 = vmatmul.mubr.bf16.vlgmr.msra.gmra.mrb[16].mxu0 %v1569_v60 }
 0x45f   :  { %2251 = vmatpush3.bf16.msra.mxu0 %v2426_v58  ;;  %1924 = vmatprep.mubr.bf16.mxu0 %v588_v2 }
 0x460   :  { %2252 = vmatprep.subr.bf16.mxu0 %v2427_v59 }
 0x463   :  { %2253 = vmatpush3.bf16.msra.mxu0 %v2428_v63 }
 0x464   :  { %2254 = vmatprep.subr.bf16.mxu0 %v2429_v34 }
 0x467   :  { %2255 = vmatpush3.bf16.msra.mxu0 %v2430_v3 }
 0x468   :  { %2256 = vmatprep.subr.bf16.mxu0 %v2431_v4 }
 0x46b   :  { %2257 = vmatpush3.bf16.msra.mxu0 %v2432_v5 }
 0x46c   :  { %2258 = vmatprep.subr.bf16.mxu0 %v2433_v6 }
 0x46f   :  { %2259 = vmatpush3.bf16.msra.mxu0 %v2434_v7 }
 0x470   :  { %2260 = vmatprep.subr.bf16.mxu0 %v2435_v8 }
 0x473   :  { %2261 = vmatpush3.bf16.msra.mxu0 %v2436_v9 }
 0x474   :  { %2262 = vmatprep.subr.bf16.mxu0 %v2437_v11 }
 0x477   :  { %2263 = vmatpush3.bf16.msra.mxu0 %v2438_v12 }
 0x478   :  { %2264 = vmatprep.subr.bf16.mxu0 %v2439_v14 }
 0x47b   :  { %2265 = vmatpush3.bf16.msra.mxu0 %v2440_v15 }
 0x47c   :  { %2290 = vmatprep.subr.bf16.mxu0 %v2709_v18 }
 0x47e   :  { %1925 = vmatmul.mubr.bf16.vlgmr.msra.gmra.mrb[20].mxu0 %v587_v13 }
 0x47f   :  { %2291 = vmatpush3.bf16.msra.mxu0 %v2441_v17  ;;  %2306 = vmatprep.mubr.msk.bf16.mxu0 %vm2710_vm1, %v2709_v18 }
 0x480   :  { %2292 = vmatprep.subr.bf16.mxu0 %v2709_v18 }
 0x483   :  { %2293 = vmatpush3.bf16.msra.mxu0 %v2442_v61 }
 0x484   :  { %2294 = vmatprep.subr.bf16.mxu0 %v2709_v18 }
 0x487   :  { %2295 = vmatpush3.bf16.msra.mxu0 %v2443_v62 }
 0x488   :  { %2296 = vmatprep.subr.bf16.mxu0 %v2709_v18 }
 0x48b   :  { %2297 = vmatpush3.bf16.msra.mxu0 %v2444_v31 }
 0x48c   :  { %2298 = vmatprep.subr.bf16.mxu0 %v2709_v18 }
 0x48f   :  { %2299 = vmatpush3.bf16.msra.mxu0 %v2445_v28 }
 0x490   :  { %2300 = vmatprep.subr.bf16.mxu0 %v2709_v18 }
 0x493   :  { %2301 = vmatpush3.bf16.msra.mxu0 %v2446_v19 }
 0x494   :  { %2302 = vmatprep.subr.bf16.mxu0 %v2709_v18 }
 0x497   :  { %2303 = vmatpush3.bf16.msra.mxu0 %v2447_v20 }
 0x498   :  { %2304 = vmatprep.subr.bf16.mxu0 %v2709_v18 }
 0x49b   :  { %2305 = vmatpush3.bf16.msra.mxu0 %v2448_v21 }
 0x49c   :  { %2310 = vmatprep.subr.bf16.mxu0 %v2709_v18 }
 0x531   :  { %v2244_v22 = vpop.f32.mrb[16].mxu0 }
 0x532   :  { %v2245_v24 = vpop.f32.mrb[17].mxu0 }
 0x533   :  { %v2246_v0 = vadd.f32 %v2245_v24, %v2244_v22  ;;  %v2247_v30 = vpop.f32.mrb[18].mxu0 }
 0x534   :  { %v2248_v25 = vpop.f32.mrb[19].mxu0 }
 0x535   :  { %v1741_v26 = vadd.f32 %v2246_v0, %v2177_v23 }
 0x537   :  { %v1746_v27 = vmax.f32 %v1741_v26, 0.0 }
 0x539   :  { %v1747_v33 = vpack.c.bf16 %v1746_v27, %v1746_v27 }
 0x53b   :  { %2307 = vmatmul.mubr.bf16.vlgmr.msra.gmra.mrb[24].mxu0 %v1747_v33 }
 0x53c   :  { %2311 = vmatpush3.bf16.msra.mxu0 %v2449_v29  ;;  %2326 = vmatprep.mubr.msk.bf16.mxu0 %vm2710_vm1, %v2709_v18 }
 0x53d   :  { %2312 = vmatprep.subr.bf16.mxu0 %v2709_v18 }
 0x540   :  { %2313 = vmatpush3.bf16.msra.mxu0 %v2450_v35 }
 0x541   :  { %2314 = vmatprep.subr.bf16.mxu0 %v2709_v18 }
 0x544   :  { %2315 = vmatpush3.bf16.msra.mxu0 %v2451_v47 }
 0x545   :  { %2316 = vmatprep.subr.bf16.mxu0 %v2709_v18 }
 0x548   :  { %2317 = vmatpush3.bf16.msra.mxu0 %v2452_v36 }
 0x549   :  { %2318 = vmatprep.subr.bf16.mxu0 %v2709_v18 }
 0x54c   :  { %2319 = vmatpush3.bf16.msra.mxu0 %v2453_v37 }
 0x54d   :  { %2320 = vmatprep.subr.bf16.mxu0 %v2709_v18 }
 0x550   :  { %2321 = vmatpush3.bf16.msra.mxu0 %v2454_v38 }
 0x551   :  { %v2266_v32 = vpop.f32.mrb[20].mxu0  ;;  %2322 = vmatprep.subr.bf16.mxu0 %v2709_v18 }
 0x552   :  { %v2267_v39 = vpop.f32.mrb[21].mxu0 }
 0x553   :  { %v2268_v40 = vadd.f32 %v2267_v39, %v2266_v32  ;;  %v2269_v1 = vpop.f32.mrb[22].mxu0 }
 0x554   :  { %v2270_v41 = vpop.f32.mrb[23].mxu0  ;;  %2323 = vmatpush3.bf16.msra.mxu0 %v2455_v42 }
 0x555   :  { %2324 = vmatprep.subr.bf16.mxu0 %v2709_v18 }
 0x558   :  { %2325 = vmatpush3.bf16.msra.mxu0 %v2456_v43 }
 0x60e   :  { %v2014_v44 = vpop.f32.mrb[24].mxu0 }
 0x60f   :  { %v2015_v46 = vadd.f32 %v2268_v40, %v2014_v44  ;;  %v2308_v48 = vpop.f32.mrb[25].mxu0 }
 0x610   :  { %v2017_v49 = vpop.f32.mrb[26].mxu0 }
 0x611   :  { %v2027_v50 = vadd.f32 %v2218_v45, %v2015_v46  ;;  %v2309_v51 = vpop.f32.mrb[27].mxu0 }
 0x613   :  { %v2028_v52 = vmax.f32 %v2027_v50, 0.0 }
 0x615   :  { %v2029_v53 = vpack.c.bf16 %v2028_v52, %v2028_v52 }
 0x617   :  { %2327 = vmatmul.mubr.bf16.vlgmr.msra.gmra.mrb[28].mxu0 %v2029_v53 }
 0x6ea   :  { %v2135_v56 = vpop.f32.mrb[28].mxu0 }
 0x6eb   :  { %v2136_v57 = vadd.f32 %v2219_v54, %v2135_v56  ;;  %v2328_v58 = vpop.f32.mrb[29].mxu0 }
 0x6ec   :  { %v2138_v60 = vpop.f32.mrb[30].mxu0 }
 0x6ed   :  { %2141 = vst [vmem:[%s3063_s16] sm:$0xff] %v2136_v57  ;;  %v2329_v59 = vpop.f32.mrb[31].mxu0 }
 0x6ee   :  { %2146 = vsyncpa [#allocation3], 1 }
 0x6ef   :  { %2147 = vsyncpa [#allocation5], 1 }
 0x6f0   :  { %2148 = vsyncpa [#allocation8], 1 }
 0x6f1   :  { %2149 = vsyncpa [#allocation11], 1 }
 0x6f2   :  { %2150 = vsyncpa [#allocation14], 1 }
 0x6f3   :  { %2151 = vsyncpa [#allocation17], 1 }

</bundles_post_ra>
